<compile_context>
chip_gen: v7x
topology: tpu7x:2x2x1
jax: 0.10.0
libtpu: 0.0.40
codegen_flags: <defaults>
</compile_context>

<pallas_src>
import functools
import math

import numpy as np
import jax
import jax.numpy as jnp
from jax import lax
from jax.experimental import pallas as pl
from jax.experimental.pallas import tpu as pltpu

CP = 128  # padded channel width == one full lane dimension


# -----------------------------------------------------------------------------
# Pallas kernel: entire bottleneck fused, single grid step, all-128-lane tiles.
# -----------------------------------------------------------------------------
def bottleneck_kernel(x_ref, m_ref, w1_ref, b1_ref, w2_ref, b2_ref,
                      w3_ref, b3_ref, o_ref, *, W):
    R = x_ref.shape[0]

    # ---- conv1 (1x1, BN1 scale folded into weights) + bias + ReLU -----------
    h1 = jnp.dot(x_ref[...].astype(jnp.bfloat16), w1_ref[...],
                 preferred_element_type=jnp.float32)
    h1 = jnp.maximum(h1 + b1_ref[...], 0.0)                     # (R, CP) f32

    # ---- conv2 (3x3 grouped, pad=1, stride=1, BN2 scale folded) -------------
    # Tap (kh, kw) = row shift by off = (kh-1)*W + (kw-1) via pltpu.roll
    # (XLU), zeroed where the source pixel falls outside the image via the
    # (R, 1) 0/1 border mask (lane-broadcast multiply on the VPU), then
    # accumulated per tap in f32 so only one (128,128) tap is live at a time.
    acc = jnp.zeros_like(h1)
    for kh in range(3):
        for kw in range(3):
            t = kh * 3 + kw
            off = (kh - 1) * W + (kw - 1)
            if off == 0:
                tap = h1                                        # center: no mask
            else:
                tap = pltpu.roll(h1, shift=(-off) % R, axis=0) * m_ref[t]
            acc = acc + jnp.dot(tap.astype(jnp.bfloat16), w2_ref[t],
                                preferred_element_type=jnp.float32)
    h2 = jnp.maximum(acc + b2_ref[...], 0.0).astype(jnp.bfloat16)

    # ---- conv3 (1x1, BN3 scale folded) + bias + residual + ReLU -------------
    h3 = jnp.dot(h2, w3_ref[...], preferred_element_type=jnp.float32)
    # Re-read x for the residual (cheap vld) instead of keeping it live.
    o_ref[...] = jnp.maximum(h3 + b3_ref[...] + x_ref[...], 0.0)   # (R, CP) f32


# -----------------------------------------------------------------------------
# Host-side helpers (pure layout glue).
# -----------------------------------------------------------------------------
def build_tap_masks(N, H, W):
    """(9, N*H*W, 1) f32 0/1 masks: tap t=kh*3+kw is valid at output pixel
    (n,h,w) iff (h+kh-1, w+kw-1) lies inside the image (conv padding=1).
    O(9*R) data -- this is just the conv zero-padding border."""
    R = N * H * W
    m = np.zeros((9, R, 1), np.float32)
    for kh in range(3):
        for kw in range(3):
            t = kh * 3 + kw
            dh, dw = kh - 1, kw - 1
            for n in range(N):
                for h in range(H):
                    if not (0 <= h + dh < H):
                        continue
                    for w in range(W):
                        if 0 <= w + dw < W:
                            m[t, (n * H + h) * W + w, 0] = 1.0
    return m


def bottleneck_forward(x_nchw, kp):
    N, Cin, H, W = x_nchw.shape
    Cout = kp["cout"]
    R = N * H * W
    assert R % 8 == 0

    # NCHW -> lane-dense (N*H*W, CP) slab: channels on lanes, zero-padded.
    x2d = jnp.transpose(x_nchw, (0, 2, 3, 1)).reshape(R, Cin).astype(jnp.float32)
    x2d = jnp.pad(x2d, ((0, 0), (0, CP - Cin)))

    masks = jnp.asarray(build_tap_masks(N, H, W))                # (9, R, 1) f32

    kernel = functools.partial(bottleneck_kernel, W=W)

    out2d = pl.pallas_call(
        kernel,
        out_shape=jax.ShapeDtypeStruct((R, CP), jnp.float32),
        grid_spec=pltpu.PrefetchScalarGridSpec(
            num_scalar_prefetch=0,
            grid=(1,),
            in_specs=[
                pl.BlockSpec((R, CP), lambda i: (0, 0)),          # x (f32)
                pl.BlockSpec((9, R, 1), lambda i: (0, 0, 0)),     # tap masks (f32)
                pl.BlockSpec((CP, CP), lambda i: (0, 0)),         # w1 (bf16)
                pl.BlockSpec((1, CP), lambda i: (0, 0)),          # b1 (f32)
                pl.BlockSpec((9, CP, CP), lambda i: (0, 0, 0)),   # w2 per-tap (bf16)
                pl.BlockSpec((1, CP), lambda i: (0, 0)),          # b2 (f32)
                pl.BlockSpec((CP, CP), lambda i: (0, 0)),         # w3 (bf16)
                pl.BlockSpec((1, CP), lambda i: (0, 0)),          # b3 (f32)
            ],
            out_specs=pl.BlockSpec((R, CP), lambda i: (0, 0)),
        ),
        compiler_params=pltpu.CompilerParams(
            dimension_semantics=("arbitrary",)),
    )(x2d, masks, kp["w1"], kp["b1"], kp["w2"], kp["b2"], kp["w3"], kp["b3"])

    out = out2d[:, :Cout].reshape(N, H, W, Cout)
    return jnp.transpose(out, (0, 3, 1, 2))                      # back to NCHW


# -----------------------------------------------------------------------------
# Deterministic parameter construction (synthetic, PyTorch-equivalent shapes)
# plus BN folding, channel padding to 128 lanes and bf16 weight cast.
# -----------------------------------------------------------------------------
def make_params(inplanes, planes, base_width, cardinality, key):
    D = int(math.floor(planes * (base_width / 64.0)))
    C = cardinality
    DC = D * C
    Cout = planes * 4
    eps = 1e-5
    assert max(inplanes, DC, Cout) <= CP

    keys = jax.random.split(key, 16)
    w1_oihw = jax.random.normal(keys[0], (DC, inplanes, 1, 1), jnp.float32) * 0.1
    w2_g = jax.random.normal(keys[1], (DC, D, 3, 3), jnp.float32) * 0.1  # groups=C
    w3_oihw = jax.random.normal(keys[2], (Cout, DC, 1, 1), jnp.float32) * 0.1

    def bn_params(kg, kb, km, kv, ch):
        g = jax.random.normal(kg, (ch,), jnp.float32) * 0.1 + 1.0
        b = jax.random.normal(kb, (ch,), jnp.float32) * 0.1
        m = jax.random.normal(km, (ch,), jnp.float32) * 0.1
        v = jax.random.uniform(kv, (ch,), jnp.float32, 0.5, 1.5)
        return g, b, m, v

    bn1 = bn_params(*keys[3:7], DC)
    bn2 = bn_params(*keys[7:11], DC)
    bn3 = bn_params(*keys[11:15], Cout)

    def fold(g, b, m, v):
        s = g / jnp.sqrt(v + eps)
        return s, b - m * s

    s1, b1 = fold(*bn1)
    s2, b2 = fold(*bn2)
    s3, b3 = fold(*bn3)

    # conv1: (inplanes, DC) matmul weight, BN1 scale folded, padded to (CP, CP)
    w1 = jnp.transpose(w1_oihw[:, :, 0, 0], (1, 0)) * s1[None, :]
    w1p = jnp.zeros((CP, CP), jnp.float32).at[:inplanes, :DC].set(w1)

    # conv2: grouped 3x3 -> per-tap block-diagonal dense weight, BN2 folded,
    # padded to (9, CP, CP) (tap-major, kh*3+kw).
    w2_dense = jnp.zeros((3, 3, DC, DC), jnp.float32)
    for g in range(C):
        blk = w2_g[g * D:(g + 1) * D]                     # (D_out, D_in, 3, 3)
        w2_dense = w2_dense.at[:, :, g * D:(g + 1) * D, g * D:(g + 1) * D].set(
            jnp.transpose(blk, (2, 3, 1, 0)))             # (3,3,D_in,D_out)
    w2_dense = w2_dense * s2[None, None, None, :]
    w2p = jnp.zeros((9, CP, CP), jnp.float32).at[:, :DC, :DC].set(
        w2_dense.reshape(9, DC, DC))

    # conv3: (DC, Cout), BN3 scale folded, padded to (CP, CP)
    w3 = jnp.transpose(w3_oihw[:, :, 0, 0], (1, 0)) * s3[None, :]
    w3p = jnp.zeros((CP, CP), jnp.float32).at[:DC, :Cout].set(w3)

    def padb(b, ch):
        return jnp.zeros((1, CP), jnp.float32).at[0, :ch].set(b)

    kernel_params = dict(
        w1=w1p.astype(jnp.bfloat16), b1=padb(b1, DC),
        w2=w2p.astype(jnp.bfloat16), b2=padb(b2, DC),
        w3=w3p.astype(jnp.bfloat16), b3=padb(b3, Cout),
        cout=Cout)
    torch_params = dict(w1=w1_oihw, w2=w2_g, w3=w3_oihw,
                        bn1=bn1, bn2=bn2, bn3=bn3, C=C, eps=eps)
    return kernel_params, torch_params


# -----------------------------------------------------------------------------
# Pure-JAX f32 reference of the PyTorch forward (for correctness check).
# -----------------------------------------------------------------------------
def reference_forward(x, tp):
    dn = ("NCHW", "OIHW", "NCHW")
    eps = tp["eps"]

    def bn(y, p):
        g, b, m, v = (t[None, :, None, None] for t in p)
        return (y - m) / jnp.sqrt(v + eps) * g + b

    out = lax.conv_general_dilated(x, tp["w1"], (1, 1), "VALID",
                                   dimension_numbers=dn)
    out = jax.nn.relu(bn(out, tp["bn1"]))
    out = lax.conv_general_dilated(out, tp["w2"], (1, 1), ((1, 1), (1, 1)),
                                   dimension_numbers=dn,
                                   feature_group_count=tp["C"])
    out = jax.nn.relu(bn(out, tp["bn2"]))
    out = lax.conv_general_dilated(out, tp["w3"], (1, 1), "VALID",
                                   dimension_numbers=dn)
    out = bn(out, tp["bn3"])
    return jax.nn.relu(out + x)


if __name__ == "__main__":
    # Bottleneck(inplanes=32, planes=8, base_width=64, cardinality=2,
    #            stride=1, dilation=1, norm='bn', conv='normal',
    #            context='none', downsample=None)
    inplanes, planes, base_width, cardinality = 32, 8, 64, 2
    N, H, W = 2, 8, 8          # N*H*W = 128 rows -> one full MXU/vreg tile

    key = jax.random.PRNGKey(0)
    kx, kparam = jax.random.split(key)
    x = jax.random.normal(kx, (N, inplanes, H, W), jnp.float32)

    kernel_params, torch_params = make_params(inplanes, planes, base_width,
                                              cardinality, kparam)

    out = bottleneck_forward(x, kernel_params)
    out = jax.block_until_ready(out)

    ref = reference_forward(x, torch_params)
    assert out.shape == ref.shape == (N, planes * 4, H, W)
    max_err = float(jnp.max(jnp.abs(out - ref)))
    # bf16 matmuls (f32 accumulation) vs f32 reference -> relaxed tolerance.
    assert jnp.allclose(out, ref, atol=2e-2, rtol=2e-2), f"max err {max_err}"

    print("KERNEL_OK")
</pallas_src>

<mosaic_0001>
module attributes {stable_mosaic.version = 11 : i64} {
  func.func @bottleneck_kernel(%arg0: i32, %arg1: memref<128x128xf32, #tpu.memory_space<vmem>>, %arg2: memref<9x128x1xf32, #tpu.memory_space<vmem>>, %arg3: memref<128x128xbf16, #tpu.memory_space<vmem>>, %arg4: memref<1x128xf32, #tpu.memory_space<vmem>>, %arg5: memref<9x128x128xbf16, #tpu.memory_space<vmem>>, %arg6: memref<1x128xf32, #tpu.memory_space<vmem>>, %arg7: memref<128x128xbf16, #tpu.memory_space<vmem>>, %arg8: memref<1x128xf32, #tpu.memory_space<vmem>>, %arg9: memref<128x128xf32, #tpu.memory_space<vmem>>) attributes {dimension_semantics = [#tpu.dimension_semantics<arbitrary>], iteration_bounds = array<i64: 1>, scalar_prefetch = 0 : i64, scratch_operands = 0 : i64, tpu.core_type = #tpu.core_type<tc>, window_params = [{pipeline_mode = #tpu.pipeline_mode<synchronous>, transform_indices = @transform_0, window_bounds = array<i64: 128, 128>}, {pipeline_mode = #tpu.pipeline_mode<synchronous>, transform_indices = @transform_1, window_bounds = array<i64: 9, 128, 1>}, {pipeline_mode = #tpu.pipeline_mode<synchronous>, transform_indices = @transform_2, window_bounds = array<i64: 128, 128>}, {pipeline_mode = #tpu.pipeline_mode<synchronous>, transform_indices = @transform_3, window_bounds = array<i64: 1, 128>}, {pipeline_mode = #tpu.pipeline_mode<synchronous>, transform_indices = @transform_4, window_bounds = array<i64: 9, 128, 128>}, {pipeline_mode = #tpu.pipeline_mode<synchronous>, transform_indices = @transform_5, window_bounds = array<i64: 1, 128>}, {pipeline_mode = #tpu.pipeline_mode<synchronous>, transform_indices = @transform_6, window_bounds = array<i64: 128, 128>}, {pipeline_mode = #tpu.pipeline_mode<synchronous>, transform_indices = @transform_7, window_bounds = array<i64: 1, 128>}, {pipeline_mode = #tpu.pipeline_mode<synchronous>, transform_indices = @transform_8, window_bounds = array<i64: 128, 128>}]} {
    %c0 = arith.constant 0 : index
    %c0_0 = arith.constant 0 : index
    %0 = vector.load %arg1[%c0, %c0_0] : memref<128x128xf32, #tpu.memory_space<vmem>>, vector<128x128xf32>
    %1 = arith.truncf %0 : vector<128x128xf32> to vector<128x128xbf16>
    %c0_1 = arith.constant 0 : index
    %c0_2 = arith.constant 0 : index
    %2 = vector.load %arg3[%c0_1, %c0_2] : memref<128x128xbf16, #tpu.memory_space<vmem>>, vector<128x128xbf16>
    %cst = arith.constant dense<0.000000e+00> : vector<128x128xf32>
    %3 = tpu.matmul %1, %2, %cst {dimension_numbers = #tpu.dot_dimension_numbers<[1], [0], [0], [1], [0, 0, 1, 1], [], []>} : vector<128x128xbf16>, vector<128x128xbf16>, vector<128x128xf32> -> vector<128x128xf32>
    %c0_3 = arith.constant 0 : index
    %c0_4 = arith.constant 0 : index
    %4 = vector.load %arg4[%c0_3, %c0_4] : memref<1x128xf32, #tpu.memory_space<vmem>>, vector<1x128xf32>
    %5 = vector.broadcast %4 : vector<1x128xf32> to vector<128x128xf32>
    %6 = arith.addf %3, %5 : vector<128x128xf32>
    %cst_5 = arith.constant 0.000000e+00 : f32
    %7 = vector.broadcast %cst_5 : f32 to vector<128x128xf32>
    %8 = arith.maximumf %6, %7 : vector<128x128xf32>
    %cst_6 = arith.constant 0.000000e+00 : f32
    %9 = vector.broadcast %cst_6 : f32 to vector<128x128xf32>
    %c9_i32 = arith.constant 9 : i32
    %10 = tpu.dynamic_rotate %8 by %c9_i32 dim 0 : vector<128x128xf32>, i32 -> vector<128x128xf32>
    %c0_7 = arith.constant 0 : index
    %c0_8 = arith.constant 0 : index
    %c0_9 = arith.constant 0 : index
    %11 = vector.load %arg2[%c0_7, %c0_8, %c0_9] : memref<9x128x1xf32, #tpu.memory_space<vmem>>, vector<1x128x1xf32>
    %12 = vector.shape_cast %11 : vector<1x128x1xf32> to vector<128x1xf32>
    %13 = vector.broadcast %12 : vector<128x1xf32> to vector<128x128xf32>
    %14 = arith.mulf %10, %13 : vector<128x128xf32>
    %15 = arith.truncf %14 : vector<128x128xf32> to vector<128x128xbf16>
    %c0_10 = arith.constant 0 : index
    %c0_11 = arith.constant 0 : index
    %c0_12 = arith.constant 0 : index
    %16 = vector.load %arg5[%c0_10, %c0_11, %c0_12] : memref<9x128x128xbf16, #tpu.memory_space<vmem>>, vector<1x128x128xbf16>
    %17 = vector.shape_cast %16 : vector<1x128x128xbf16> to vector<128x128xbf16>
    %cst_13 = arith.constant dense<0.000000e+00> : vector<128x128xf32>
    %18 = tpu.matmul %15, %17, %cst_13 {dimension_numbers = #tpu.dot_dimension_numbers<[1], [0], [0], [1], [0, 0, 1, 1], [], []>} : vector<128x128xbf16>, vector<128x128xbf16>, vector<128x128xf32> -> vector<128x128xf32>
    %19 = arith.addf %9, %18 : vector<128x128xf32>
    %c8_i32 = arith.constant 8 : i32
    %20 = tpu.dynamic_rotate %8 by %c8_i32 dim 0 : vector<128x128xf32>, i32 -> vector<128x128xf32>
    %c1 = arith.constant 1 : index
    %c0_14 = arith.constant 0 : index
    %c0_15 = arith.constant 0 : index
    %21 = vector.load %arg2[%c1, %c0_14, %c0_15] : memref<9x128x1xf32, #tpu.memory_space<vmem>>, vector<1x128x1xf32>
    %22 = vector.shape_cast %21 : vector<1x128x1xf32> to vector<128x1xf32>
    %23 = vector.broadcast %22 : vector<128x1xf32> to vector<128x128xf32>
    %24 = arith.mulf %20, %23 : vector<128x128xf32>
    %25 = arith.truncf %24 : vector<128x128xf32> to vector<128x128xbf16>
    %c1_16 = arith.constant 1 : index
    %c0_17 = arith.constant 0 : index
    %c0_18 = arith.constant 0 : index
    %26 = vector.load %arg5[%c1_16, %c0_17, %c0_18] : memref<9x128x128xbf16, #tpu.memory_space<vmem>>, vector<1x128x128xbf16>
    %27 = vector.shape_cast %26 : vector<1x128x128xbf16> to vector<128x128xbf16>
    %cst_19 = arith.constant dense<0.000000e+00> : vector<128x128xf32>
    %28 = tpu.matmul %25, %27, %cst_19 {dimension_numbers = #tpu.dot_dimension_numbers<[1], [0], [0], [1], [0, 0, 1, 1], [], []>} : vector<128x128xbf16>, vector<128x128xbf16>, vector<128x128xf32> -> vector<128x128xf32>
    %29 = arith.addf %19, %28 : vector<128x128xf32>
    %c7_i32 = arith.constant 7 : i32
    %30 = tpu.dynamic_rotate %8 by %c7_i32 dim 0 : vector<128x128xf32>, i32 -> vector<128x128xf32>
    %c2 = arith.constant 2 : index
    %c0_20 = arith.constant 0 : index
    %c0_21 = arith.constant 0 : index
    %31 = vector.load %arg2[%c2, %c0_20, %c0_21] : memref<9x128x1xf32, #tpu.memory_space<vmem>>, vector<1x128x1xf32>
    %32 = vector.shape_cast %31 : vector<1x128x1xf32> to vector<128x1xf32>
    %33 = vector.broadcast %32 : vector<128x1xf32> to vector<128x128xf32>
    %34 = arith.mulf %30, %33 : vector<128x128xf32>
    %35 = arith.truncf %34 : vector<128x128xf32> to vector<128x128xbf16>
    %c2_22 = arith.constant 2 : index
    %c0_23 = arith.constant 0 : index
    %c0_24 = arith.constant 0 : index
    %36 = vector.load %arg5[%c2_22, %c0_23, %c0_24] : memref<9x128x128xbf16, #tpu.memory_space<vmem>>, vector<1x128x128xbf16>
    %37 = vector.shape_cast %36 : vector<1x128x128xbf16> to vector<128x128xbf16>
    %cst_25 = arith.constant dense<0.000000e+00> : vector<128x128xf32>
    %38 = tpu.matmul %35, %37, %cst_25 {dimension_numbers = #tpu.dot_dimension_numbers<[1], [0], [0], [1], [0, 0, 1, 1], [], []>} : vector<128x128xbf16>, vector<128x128xbf16>, vector<128x128xf32> -> vector<128x128xf32>
    %39 = arith.addf %29, %38 : vector<128x128xf32>
    %c1_i32 = arith.constant 1 : i32
    %40 = tpu.dynamic_rotate %8 by %c1_i32 dim 0 : vector<128x128xf32>, i32 -> vector<128x128xf32>
    %c3 = arith.constant 3 : index
    %c0_26 = arith.constant 0 : index
    %c0_27 = arith.constant 0 : index
    %41 = vector.load %arg2[%c3, %c0_26, %c0_27] : memref<9x128x1xf32, #tpu.memory_space<vmem>>, vector<1x128x1xf32>
    %42 = vector.shape_cast %41 : vector<1x128x1xf32> to vector<128x1xf32>
    %43 = vector.broadcast %42 : vector<128x1xf32> to vector<128x128xf32>
    %44 = arith.mulf %40, %43 : vector<128x128xf32>
    %45 = arith.truncf %44 : vector<128x128xf32> to vector<128x128xbf16>
    %c3_28 = arith.constant 3 : index
    %c0_29 = arith.constant 0 : index
    %c0_30 = arith.constant 0 : index
    %46 = vector.load %arg5[%c3_28, %c0_29, %c0_30] : memref<9x128x128xbf16, #tpu.memory_space<vmem>>, vector<1x128x128xbf16>
    %47 = vector.shape_cast %46 : vector<1x128x128xbf16> to vector<128x128xbf16>
    %cst_31 = arith.constant dense<0.000000e+00> : vector<128x128xf32>
    %48 = tpu.matmul %45, %47, %cst_31 {dimension_numbers = #tpu.dot_dimension_numbers<[1], [0], [0], [1], [0, 0, 1, 1], [], []>} : vector<128x128xbf16>, vector<128x128xbf16>, vector<128x128xf32> -> vector<128x128xf32>
    %49 = arith.addf %39, %48 : vector<128x128xf32>
    %50 = arith.truncf %8 : vector<128x128xf32> to vector<128x128xbf16>
    %c4 = arith.constant 4 : index
    %c0_32 = arith.constant 0 : index
    %c0_33 = arith.constant 0 : index
    %51 = vector.load %arg5[%c4, %c0_32, %c0_33] : memref<9x128x128xbf16, #tpu.memory_space<vmem>>, vector<1x128x128xbf16>
    %52 = vector.shape_cast %51 : vector<1x128x128xbf16> to vector<128x128xbf16>
    %cst_34 = arith.constant dense<0.000000e+00> : vector<128x128xf32>
    %53 = tpu.matmul %50, %52, %cst_34 {dimension_numbers = #tpu.dot_dimension_numbers<[1], [0], [0], [1], [0, 0, 1, 1], [], []>} : vector<128x128xbf16>, vector<128x128xbf16>, vector<128x128xf32> -> vector<128x128xf32>
    %54 = arith.addf %49, %53 : vector<128x128xf32>
    %c127_i32 = arith.constant 127 : i32
    %55 = tpu.dynamic_rotate %8 by %c127_i32 dim 0 : vector<128x128xf32>, i32 -> vector<128x128xf32>
    %c5 = arith.constant 5 : index
    %c0_35 = arith.constant 0 : index
    %c0_36 = arith.constant 0 : index
    %56 = vector.load %arg2[%c5, %c0_35, %c0_36] : memref<9x128x1xf32, #tpu.memory_space<vmem>>, vector<1x128x1xf32>
    %57 = vector.shape_cast %56 : vector<1x128x1xf32> to vector<128x1xf32>
    %58 = vector.broadcast %57 : vector<128x1xf32> to vector<128x128xf32>
    %59 = arith.mulf %55, %58 : vector<128x128xf32>
    %60 = arith.truncf %59 : vector<128x128xf32> to vector<128x128xbf16>
    %c5_37 = arith.constant 5 : index
    %c0_38 = arith.constant 0 : index
    %c0_39 = arith.constant 0 : index
    %61 = vector.load %arg5[%c5_37, %c0_38, %c0_39] : memref<9x128x128xbf16, #tpu.memory_space<vmem>>, vector<1x128x128xbf16>
    %62 = vector.shape_cast %61 : vector<1x128x128xbf16> to vector<128x128xbf16>
    %cst_40 = arith.constant dense<0.000000e+00> : vector<128x128xf32>
    %63 = tpu.matmul %60, %62, %cst_40 {dimension_numbers = #tpu.dot_dimension_numbers<[1], [0], [0], [1], [0, 0, 1, 1], [], []>} : vector<128x128xbf16>, vector<128x128xbf16>, vector<128x128xf32> -> vector<128x128xf32>
    %64 = arith.addf %54, %63 : vector<128x128xf32>
    %c121_i32 = arith.constant 121 : i32
    %65 = tpu.dynamic_rotate %8 by %c121_i32 dim 0 : vector<128x128xf32>, i32 -> vector<128x128xf32>
    %c6 = arith.constant 6 : index
    %c0_41 = arith.constant 0 : index
    %c0_42 = arith.constant 0 : index
    %66 = vector.load %arg2[%c6, %c0_41, %c0_42] : memref<9x128x1xf32, #tpu.memory_space<vmem>>, vector<1x128x1xf32>
    %67 = vector.shape_cast %66 : vector<1x128x1xf32> to vector<128x1xf32>
    %68 = vector.broadcast %67 : vector<128x1xf32> to vector<128x128xf32>
    %69 = arith.mulf %65, %68 : vector<128x128xf32>
    %70 = arith.truncf %69 : vector<128x128xf32> to vector<128x128xbf16>
    %c6_43 = arith.constant 6 : index
    %c0_44 = arith.constant 0 : index
    %c0_45 = arith.constant 0 : index
    %71 = vector.load %arg5[%c6_43, %c0_44, %c0_45] : memref<9x128x128xbf16, #tpu.memory_space<vmem>>, vector<1x128x128xbf16>
    %72 = vector.shape_cast %71 : vector<1x128x128xbf16> to vector<128x128xbf16>
    %cst_46 = arith.constant dense<0.000000e+00> : vector<128x128xf32>
    %73 = tpu.matmul %70, %72, %cst_46 {dimension_numbers = #tpu.dot_dimension_numbers<[1], [0], [0], [1], [0, 0, 1, 1], [], []>} : vector<128x128xbf16>, vector<128x128xbf16>, vector<128x128xf32> -> vector<128x128xf32>
    %74 = arith.addf %64, %73 : vector<128x128xf32>
    %c120_i32 = arith.constant 120 : i32
    %75 = tpu.dynamic_rotate %8 by %c120_i32 dim 0 : vector<128x128xf32>, i32 -> vector<128x128xf32>
    %c7 = arith.constant 7 : index
    %c0_47 = arith.constant 0 : index
    %c0_48 = arith.constant 0 : index
    %76 = vector.load %arg2[%c7, %c0_47, %c0_48] : memref<9x128x1xf32, #tpu.memory_space<vmem>>, vector<1x128x1xf32>
    %77 = vector.shape_cast %76 : vector<1x128x1xf32> to vector<128x1xf32>
    %78 = vector.broadcast %77 : vector<128x1xf32> to vector<128x128xf32>
    %79 = arith.mulf %75, %78 : vector<128x128xf32>
    %80 = arith.truncf %79 : vector<128x128xf32> to vector<128x128xbf16>
    %c7_49 = arith.constant 7 : index
    %c0_50 = arith.constant 0 : index
    %c0_51 = arith.constant 0 : index
    %81 = vector.load %arg5[%c7_49, %c0_50, %c0_51] : memref<9x128x128xbf16, #tpu.memory_space<vmem>>, vector<1x128x128xbf16>
    %82 = vector.shape_cast %81 : vector<1x128x128xbf16> to vector<128x128xbf16>
    %cst_52 = arith.constant dense<0.000000e+00> : vector<128x128xf32>
    %83 = tpu.matmul %80, %82, %cst_52 {dimension_numbers = #tpu.dot_dimension_numbers<[1], [0], [0], [1], [0, 0, 1, 1], [], []>} : vector<128x128xbf16>, vector<128x128xbf16>, vector<128x128xf32> -> vector<128x128xf32>
    %84 = arith.addf %74, %83 : vector<128x128xf32>
    %c119_i32 = arith.constant 119 : i32
    %85 = tpu.dynamic_rotate %8 by %c119_i32 dim 0 : vector<128x128xf32>, i32 -> vector<128x128xf32>
    %c8 = arith.constant 8 : index
    %c0_53 = arith.constant 0 : index
    %c0_54 = arith.constant 0 : index
    %86 = vector.load %arg2[%c8, %c0_53, %c0_54] : memref<9x128x1xf32, #tpu.memory_space<vmem>>, vector<1x128x1xf32>
    %87 = vector.shape_cast %86 : vector<1x128x1xf32> to vector<128x1xf32>
    %88 = vector.broadcast %87 : vector<128x1xf32> to vector<128x128xf32>
    %89 = arith.mulf %85, %88 : vector<128x128xf32>
    %90 = arith.truncf %89 : vector<128x128xf32> to vector<128x128xbf16>
    %c8_55 = arith.constant 8 : index
    %c0_56 = arith.constant 0 : index
    %c0_57 = arith.constant 0 : index
    %91 = vector.load %arg5[%c8_55, %c0_56, %c0_57] : memref<9x128x128xbf16, #tpu.memory_space<vmem>>, vector<1x128x128xbf16>
    %92 = vector.shape_cast %91 : vector<1x128x128xbf16> to vector<128x128xbf16>
    %cst_58 = arith.constant dense<0.000000e+00> : vector<128x128xf32>
    %93 = tpu.matmul %90, %92, %cst_58 {dimension_numbers = #tpu.dot_dimension_numbers<[1], [0], [0], [1], [0, 0, 1, 1], [], []>} : vector<128x128xbf16>, vector<128x128xbf16>, vector<128x128xf32> -> vector<128x128xf32>
    %94 = arith.addf %84, %93 : vector<128x128xf32>
    %c0_59 = arith.constant 0 : index
    %c0_60 = arith.constant 0 : index
    %95 = vector.load %arg6[%c0_59, %c0_60] : memref<1x128xf32, #tpu.memory_space<vmem>>, vector<1x128xf32>
    %96 = vector.broadcast %95 : vector<1x128xf32> to vector<128x128xf32>
    %97 = arith.addf %94, %96 : vector<128x128xf32>
    %cst_61 = arith.constant 0.000000e+00 : f32
    %98 = vector.broadcast %cst_61 : f32 to vector<128x128xf32>
    %99 = arith.maximumf %97, %98 : vector<128x128xf32>
    %100 = arith.truncf %99 : vector<128x128xf32> to vector<128x128xbf16>
    %c0_62 = arith.constant 0 : index
    %c0_63 = arith.constant 0 : index
    %101 = vector.load %arg7[%c0_62, %c0_63] : memref<128x128xbf16, #tpu.memory_space<vmem>>, vector<128x128xbf16>
    %cst_64 = arith.constant dense<0.000000e+00> : vector<128x128xf32>
    %102 = tpu.matmul %100, %101, %cst_64 {dimension_numbers = #tpu.dot_dimension_numbers<[1], [0], [0], [1], [0, 0, 1, 1], [], []>} : vector<128x128xbf16>, vector<128x128xbf16>, vector<128x128xf32> -> vector<128x128xf32>
    %c0_65 = arith.constant 0 : index
    %c0_66 = arith.constant 0 : index
    %103 = vector.load %arg8[%c0_65, %c0_66] : memref<1x128xf32, #tpu.memory_space<vmem>>, vector<1x128xf32>
    %104 = vector.broadcast %103 : vector<1x128xf32> to vector<128x128xf32>
    %105 = arith.addf %102, %104 : vector<128x128xf32>
    %c0_67 = arith.constant 0 : index
    %c0_68 = arith.constant 0 : index
    %106 = vector.load %arg1[%c0_67, %c0_68] : memref<128x128xf32, #tpu.memory_space<vmem>>, vector<128x128xf32>
    %107 = arith.addf %105, %106 : vector<128x128xf32>
    %cst_69 = arith.constant 0.000000e+00 : f32
    %108 = vector.broadcast %cst_69 : f32 to vector<128x128xf32>
    %109 = arith.maximumf %107, %108 : vector<128x128xf32>
    %c0_70 = arith.constant 0 : index
    %c0_71 = arith.constant 0 : index
    %110 = vector.load %arg9[%c0_70, %c0_71] : memref<128x128xf32, #tpu.memory_space<vmem>>, vector<128x128xf32>
    tpu.vector_store %arg9[%c0_70, %c0_71], %109 {strides = array<i32>} : memref<128x128xf32, #tpu.memory_space<vmem>>, vector<128x128xf32>,
    return
  }
  func.func @transform_0(%arg0: i32) -> (i32, i32) {
    %c0_i32 = arith.constant 0 : i32
    %c0_i32_0 = arith.constant 0 : i32
    %c0_i32_1 = arith.constant 0 : i32
    return %c0_i32, %c0_i32_0 : i32, i32
  }
  func.func @transform_1(%arg0: i32) -> (i32, i32, i32) {
    %c0_i32 = arith.constant 0 : i32
    %c0_i32_0 = arith.constant 0 : i32
    %c0_i32_1 = arith.constant 0 : i32
    %c0_i32_2 = arith.constant 0 : i32
    return %c0_i32, %c0_i32_0, %c0_i32_1 : i32, i32, i32
  }
  func.func @transform_2(%arg0: i32) -> (i32, i32) {
    %c0_i32 = arith.constant 0 : i32
    %c0_i32_0 = arith.constant 0 : i32
    %c0_i32_1 = arith.constant 0 : i32
    return %c0_i32, %c0_i32_0 : i32, i32
  }
  func.func @transform_3(%arg0: i32) -> (i32, i32) {
    %c0_i32 = arith.constant 0 : i32
    %c0_i32_0 = arith.constant 0 : i32
    %c0_i32_1 = arith.constant 0 : i32
    return %c0_i32, %c0_i32_0 : i32, i32
  }
  func.func @transform_4(%arg0: i32) -> (i32, i32, i32) {
    %c0_i32 = arith.constant 0 : i32
    %c0_i32_0 = arith.constant 0 : i32
    %c0_i32_1 = arith.constant 0 : i32
    %c0_i32_2 = arith.constant 0 : i32
    return %c0_i32, %c0_i32_0, %c0_i32_1 : i32, i32, i32
  }
  func.func @transform_5(%arg0: i32) -> (i32, i32) {
    %c0_i32 = arith.constant 0 : i32
    %c0_i32_0 = arith.constant 0 : i32
    %c0_i32_1 = arith.constant 0 : i32
    return %c0_i32, %c0_i32_0 : i32, i32
  }
  func.func @transform_6(%arg0: i32) -> (i32, i32) {
    %c0_i32 = arith.constant 0 : i32
    %c0_i32_0 = arith.constant 0 : i32
    %c0_i32_1 = arith.constant 0 : i32
    return %c0_i32, %c0_i32_0 : i32, i32
  }
  func.func @transform_7(%arg0: i32) -> (i32, i32) {
    %c0_i32 = arith.constant 0 : i32
    %c0_i32_0 = arith.constant 0 : i32
    %c0_i32_1 = arith.constant 0 : i32
    return %c0_i32, %c0_i32_0 : i32, i32
  }
  func.func @transform_8(%arg0: i32) -> (i32, i32) {
    %c0_i32 = arith.constant 0 : i32
    %c0_i32_0 = arith.constant 0 : i32
    %c0_i32_1 = arith.constant 0 : i32
    return %c0_i32, %c0_i32_0 : i32, i32
  }
}

</mosaic_0001>

<bundles_post_ra>
// kernel: tpu_custom_call.1
= control target key start
LH: loop header
LB: loop body
LE: loop exit
PB: predicated region body
PF: predicated region fallthrough
CT: control target
= control target key end

     0   :  { %v4251_v2 = vmov 0   ;;  %s6143_s0 = inlined_call_operand.vmem [shape: f32[128,128], index: 0, kind: input, shape index: {}]   ;;  %s6144_s1 = inlined_call_operand.vmem [shape: f32[9,128,1], index: 1, kind: input, shape index: {}]   ;;  %s6145_s2 = inlined_call_operand.vmem [shape: bf16[128,128], index: 2, kind: input, shape index: {}]   ;;  %s6146_s3 = inlined_call_operand.vmem [shape: f32[1,128], index: 3, kind: input, shape index: {}]   ;;  %s6147_s4 = inlined_call_operand.vmem [shape: bf16[9,128,128], index: 4, kind: input, shape index: {}]   ;;  %s6148_s5 = inlined_call_operand.vmem [shape: f32[1,128], index: 5, kind: input, shape index: {}]   ;;  %s6149_s6 = inlined_call_operand.vmem [shape: bf16[128,128], index: 6, kind: input, shape index: {}]   ;;  %s6150_s7 = inlined_call_operand.vmem [shape: f32[1,128], index: 7, kind: input, shape index: {}]   ;;  %s6151_s8 = inlined_call_operand.hbm [shape: f32[128,128], index: 8, kind: output, shape index: {}]  }
   0x1   :  { %v3229_v0 = vld [vmem:[%s6144_s1 + $0x190] sm:$0xff]  ;;  %v3227_v1 = vld [vmem:[%s6144_s1 + $0x180] sm:$0xff]  ;;  %4122 = vset.pattern.permute.xlu1 %v4251_v2  ;;  %4121 = vset.pattern.permute.xlu0 %v4251_v2  ;;  %v3230_v4 = vld [vmem:[%s6144_s1 + $0x198] sm:$0xff] }
   0x2   :  { %v4123_v3 = vld [vmem:[%s6145_s2] sm:$0xff]   ;;  %1199 = vperm.xlu1 %4122, %v3229_v0   ;;  %1189 = vperm.xlu0 %4121, %v3227_v1   ;;  %v3228_v5 = vld [vmem:[%s6144_s1 + $0x188] sm:$0xff]  ;;  %v4125_v7 = vld [vmem:[%s6145_s2 + $0x10] sm:$0xff]  }
   0x3   :  { %3637 = vmatprep.subr.bf16.mxu0 %v4123_v3  ;;  %v4124_v6 = vld [vmem:[%s6145_s2 + $0x8] sm:$0xff]   ;;  %v3231_v9 = vld [vmem:[%s6144_s1 + $0x1a0] sm:$0xff]  ;;  %v4126_v10 = vld [vmem:[%s6145_s2 + $0x18] sm:$0xff]  }
   0x4   :  { %3638 = vmatpush3.bf16.msra.mxu0 %v4123_v3  ;;  %v3232_v8 = vld [vmem:[%s6144_s1 + $0x1a8] sm:$0xff]  ;;  %v3234_v11 = vld [vmem:[%s6144_s1 + $0x1b8] sm:$0xff]  ;;  %v3233_v12 = vld [vmem:[%s6144_s1 + $0x1b0] sm:$0xff] }
   0x5   :  { %3639 = vmatprep.subr.bf16.mxu0 %v4124_v6  ;;  %v4127_v13 = vld [vmem:[%s6145_s2 + $0x20] sm:$0xff]   ;;  %v32_v15 = vld [vmem:[%s6143_s0 + $0x8] sm:$0xff]  ;;  %v3238_v20 = vld [vmem:[%s6144_s1 + $0x1d8] sm:$0xff] }
   0x6   :  { %1204 = vperm.xlu1 %4122, %v3230_v4   ;;  %1194 = vperm.xlu0 %4121, %v3228_v5   ;;  %v31_v14 = vld [vmem:[%s6143_s0] sm:$0xff]  ;;  %v3236_v16 = vld [vmem:[%s6144_s1 + $0x1c8] sm:$0xff]  ;;  %v3237_v21 = vld [vmem:[%s6144_s1 + $0x1d0] sm:$0xff] }
   0x7   :  { %v3235_v17 = vld [vmem:[%s6144_s1 + $0x1c0] sm:$0xff]  ;;  %v47_v18 = vpack.c.bf16 %v32_v15, %v31_v14  ;;  %v4128_v19 = vld [vmem:[%s6145_s2 + $0x28] sm:$0xff]   ;;  %v4129_v22 = vld [vmem:[%s6145_s2 + $0x30] sm:$0xff]  }
   0x8   :  { %3640 = vmatpush3.bf16.msra.mxu0 %v4124_v6  ;;  %v3240_v23 = vld [vmem:[%s6144_s1 + $0x1e8] sm:$0xff]  ;;  %v3239_v24 = vld [vmem:[%s6144_s1 + $0x1e0] sm:$0xff]  ;;  %v4130_v25 = vld [vmem:[%s6145_s2 + $0x38] sm:$0xff]  }
   0x9   :  { %3641 = vmatprep.subr.bf16.mxu0 %v4125_v7  ;;  %3653 = vmatprep.mubr.bf16.mxu0 %v47_v18  ;;  %v3242_v26 = vld [vmem:[%s6144_s1 + $0x1f8] sm:$0xff]  ;;  %v3241_v27 = vld [vmem:[%s6144_s1 + $0x1f0] sm:$0xff]  ;;  %v35_v30 = vld [vmem:[%s6143_s0 + $0x20] sm:$0xff] }
   0xa   :  { %1214 = vperm.xlu1 %4122, %v3232_v8   ;;  %1209 = vperm.xlu0 %4121, %v3231_v9   ;;  %v33_v28 = vld [vmem:[%s6143_s0 + $0x10] sm:$0xff]  ;;  %v34_v29 = vld [vmem:[%s6143_s0 + $0x18] sm:$0xff]  ;;  %v36_v31 = vld [vmem:[%s6143_s0 + $0x28] sm:$0xff] }
   0xb   :  { %v3292_v32 = vld [vmem:[%s6144_s1 + $0x288] sm:$0xff]  ;;  %v3291_v33 = vld [vmem:[%s6144_s1 + $0x280] sm:$0xff]  ;;  %v48_v34 = vpack.c.bf16 %v34_v29, %v33_v28  ;;  %v49_v35 = vpack.c.bf16 %v36_v31, %v35_v30  ;;  %v3294_v36 = vld [vmem:[%s6144_s1 + $0x298] sm:$0xff] }
   0xc   :  { %3642 = vmatpush3.bf16.msra.mxu0 %v4125_v7  ;;  %v3293_v37 = vld [vmem:[%s6144_s1 + $0x290] sm:$0xff]  ;;  %v38_v39 = vld [vmem:[%s6143_s0 + $0x38] sm:$0xff]  ;;  %v39_v40 = vld [vmem:[%s6143_s0 + $0x40] sm:$0xff] }
   0xd   :  { %3643 = vmatprep.subr.bf16.mxu0 %v4126_v10  ;;  %v37_v38 = vld [vmem:[%s6143_s0 + $0x30] sm:$0xff]  ;;  %v40_v41 = vld [vmem:[%s6143_s0 + $0x48] sm:$0xff]  ;;  %v3295_v43 = vld [vmem:[%s6144_s1 + $0x2a0] sm:$0xff] }
   0xe   :  { %1224 = vperm.xlu1 %4122, %v3234_v11   ;;  %1219 = vperm.xlu0 %4121, %v3233_v12   ;;  %v3296_v42 = vld [vmem:[%s6144_s1 + $0x2a8] sm:$0xff]  ;;  %v50_v44 = vpack.c.bf16 %v38_v39, %v37_v38  ;;  %v51_v45 = vpack.c.bf16 %v40_v41, %v39_v40  ;;  %v3298_v46 = vld [vmem:[%s6144_s1 + $0x2b8] sm:$0xff]  ;;  %v3297_v47 = vld [vmem:[%s6144_s1 + $0x2b0] sm:$0xff] }
   0xf   :  { %v41_v48 = vld [vmem:[%s6143_s0 + $0x50] sm:$0xff]  ;;  %v42_v49 = vld [vmem:[%s6143_s0 + $0x58] sm:$0xff]  ;;  %v43_v50 = vld [vmem:[%s6143_s0 + $0x60] sm:$0xff] }
  0x10   :  { %3644 = vmatpush3.bf16.msra.mxu0 %v4126_v10  ;;  %v3300_v51 = vld [vmem:[%s6144_s1 + $0x2c8] sm:$0xff]  ;;  %v3299_v53 = vld [vmem:[%s6144_s1 + $0x2c0] sm:$0xff]  ;;  %v52_v54 = vpack.c.bf16 %v42_v49, %v41_v48  ;;  %v3302_v56 = vld [vmem:[%s6144_s1 + $0x2d8] sm:$0xff] }
  0x11   :  { %3645 = vmatprep.subr.bf16.mxu0 %v4127_v13  ;;  %v44_v52 = vld [vmem:[%s6143_s0 + $0x68] sm:$0xff]  ;;  %v3301_v57 = vld [vmem:[%s6144_s1 + $0x2d0] sm:$0xff]  ;;  %v46_v59 = vld [vmem:[%s6143_s0 + $0x78] sm:$0xff] }
  0x12   :  { %1234 = vperm.xlu1 %4122, %v3236_v16   ;;  %1229 = vperm.xlu0 %4121, %v3235_v17   ;;  %v53_v55 = vpack.c.bf16 %v44_v52, %v43_v50  ;;  %v45_v58 = vld [vmem:[%s6143_s0 + $0x70] sm:$0xff]  ;;  %v3304_v60 = vld [vmem:[%s6144_s1 + $0x2e8] sm:$0xff]  ;;  %v3303_v61 = vld [vmem:[%s6144_s1 + $0x2e0] sm:$0xff] }
  0x13   :  { %v54_v62 = vpack.c.bf16 %v46_v59, %v45_v58  ;;  %v3306_v63 = vld [vmem:[%s6144_s1 + $0x2f8] sm:$0xff]  ;;  %v3305_v0 = vld [vmem:[%s6144_s1 + $0x2f0] sm:$0xff]  ;;  %v3140_v1 = vld [vmem:[%s6144_s1 + $0x88] sm:$0xff] }
  0x14   :  { %3646 = vmatpush3.bf16.msra.mxu0 %v4127_v13  ;;  %v3139_v2 = vld [vmem:[%s6144_s1 + $0x80] sm:$0xff]  ;;  %v3332_v3 = vld [vmem:[%s6144_s1 + $0x308] sm:$0xff]  ;;  %v3142_v5 = vld [vmem:[%s6144_s1 + $0x98] sm:$0xff] }
  0x15   :  { %3647 = vmatprep.subr.bf16.mxu0 %v4128_v19  ;;  %v3331_v4 = vld [vmem:[%s6144_s1 + $0x300] sm:$0xff]  ;;  %v3141_v6 = vld [vmem:[%s6144_s1 + $0x90] sm:$0xff]  ;;  %v3334_v7 = vld [vmem:[%s6144_s1 + $0x318] sm:$0xff] }
  0x16   :  { %1244 = vperm.xlu1 %4122, %v3238_v20   ;;  %1239 = vperm.xlu0 %4121, %v3237_v21   ;;  %v3333_v8 = vld [vmem:[%s6144_s1 + $0x310] sm:$0xff]  ;;  %v3144_v9 = vld [vmem:[%s6144_s1 + $0xa8] sm:$0xff]  ;;  %v3143_v10 = vld [vmem:[%s6144_s1 + $0xa0] sm:$0xff] }
  0x17   :  { %v3336_v11 = vld [vmem:[%s6144_s1 + $0x328] sm:$0xff]  ;;  %v3335_v12 = vld [vmem:[%s6144_s1 + $0x320] sm:$0xff]  ;;  %v3146_v13 = vld [vmem:[%s6144_s1 + $0xb8] sm:$0xff] }
  0x18   :  { %3648 = vmatpush3.bf16.msra.mxu0 %v4128_v19  ;;  %v3145_v14 = vld [vmem:[%s6144_s1 + $0xb0] sm:$0xff]  ;;  %v3338_v15 = vld [vmem:[%s6144_s1 + $0x338] sm:$0xff]  ;;  %v3148_v17 = vld [vmem:[%s6144_s1 + $0xc8] sm:$0xff] }
  0x19   :  { %3649 = vmatprep.subr.bf16.mxu0 %v4129_v22  ;;  %v3337_v16 = vld [vmem:[%s6144_s1 + $0x330] sm:$0xff]  ;;  %v3147_v18 = vld [vmem:[%s6144_s1 + $0xc0] sm:$0xff]  ;;  %v3340_v19 = vld [vmem:[%s6144_s1 + $0x348] sm:$0xff] }
  0x1a   :  { %1254 = vperm.xlu1 %4122, %v3240_v23   ;;  %1249 = vperm.xlu0 %4121, %v3239_v24   ;;  %v3339_v20 = vld [vmem:[%s6144_s1 + $0x340] sm:$0xff]  ;;  %v3150_v21 = vld [vmem:[%s6144_s1 + $0xd8] sm:$0xff] }
  0x1c   :  { %3650 = vmatpush3.bf16.msra.mxu0 %v4129_v22  ;;  %v3149_v22 = vld [vmem:[%s6144_s1 + $0xd0] sm:$0xff] }
  0x1d   :  { %3651 = vmatprep.subr.bf16.mxu0 %v4130_v25 }
  0x1e   :  { %1264 = vperm.xlu1 %4122, %v3242_v26   ;;  %1259 = vperm.xlu0 %4121, %v3241_v27  }
  0x20   :  { %3652 = vmatpush3.bf16.msra.mxu0 %v4130_v25 }
  0x22   :  { %1679 = vperm.xlu1 %4122, %v3292_v32   ;;  %1674 = vperm.xlu0 %4121, %v3291_v33  }
  0x23   :  { %3654 = vmatmul.mubr.bf16.vlgmr.msra.gmra.mrb[0].mxu0 %v48_v34 }
  0x24   :  { %3657 = vmatprep.mubr.bf16.mxu0 %v49_v35 }
  0x26   :  { %1689 = vperm.xlu1 %4122, %v3294_v36   ;;  %1684 = vperm.xlu0 %4121, %v3293_v37  }
  0x2a   :  { %1699 = vperm.xlu1 %4122, %v3296_v42   ;;  %1694 = vperm.xlu0 %4121, %v3295_v43  }
  0x2b   :  { %3658 = vmatmul.mubr.bf16.gmra.mrb[4].mxu0 %v50_v44 }
  0x2c   :  { %3661 = vmatprep.mubr.bf16.mxu0 %v51_v45 }
  0x2e   :  { %1709 = vperm.xlu1 %4122, %v3298_v46   ;;  %1704 = vperm.xlu0 %4121, %v3297_v47  }
  0x32   :  { %1719 = vperm.xlu1 %4122, %v3300_v51   ;;  %1714 = vperm.xlu0 %4121, %v3299_v53  }
  0x33   :  { %3662 = vmatmul.mubr.bf16.gmra.mrb[8].mxu0 %v52_v54 }
  0x34   :  { %3665 = vmatprep.mubr.bf16.mxu0 %v53_v55 }
  0x36   :  { %1729 = vperm.xlu1 %4122, %v3302_v56   ;;  %1724 = vperm.xlu0 %4121, %v3301_v57  }
  0x3a   :  { %1739 = vperm.xlu1 %4122, %v3304_v60   ;;  %1734 = vperm.xlu0 %4121, %v3303_v61  }
  0x3b   :  { %3666 = vmatmul.mubr.bf16.gmra.mrb[12].mxu0 %v54_v62 }
  0x3e   :  { %1749 = vperm.xlu1 %4122, %v3306_v63   ;;  %1744 = vperm.xlu0 %4121, %v3305_v0  }
  0x42   :  { %434 = vperm.xlu1 %4122, %v3140_v1   ;;  %429 = vperm.xlu0 %4121, %v3139_v2  }
  0x46   :  { %1978 = vperm.xlu1 %4122, %v3332_v3   ;;  %1973 = vperm.xlu0 %4121, %v3331_v4  }
  0x4a   :  { %444 = vperm.xlu1 %4122, %v3142_v5   ;;  %439 = vperm.xlu0 %4121, %v3141_v6  }
  0x4e   :  { %1988 = vperm.xlu1 %4122, %v3334_v7   ;;  %1983 = vperm.xlu0 %4121, %v3333_v8  }
  0x52   :  { %454 = vperm.xlu1 %4122, %v3144_v9   ;;  %449 = vperm.xlu0 %4121, %v3143_v10  }
  0x56   :  { %1998 = vperm.xlu1 %4122, %v3336_v11   ;;  %1993 = vperm.xlu0 %4121, %v3335_v12  }
  0x5a   :  { %464 = vperm.xlu1 %4122, %v3146_v13   ;;  %459 = vperm.xlu0 %4121, %v3145_v14  }
  0x5e   :  { %2008 = vperm.xlu1 %4122, %v3338_v15   ;;  %2003 = vperm.xlu0 %4121, %v3337_v16  }
  0x62   :  { %474 = vperm.xlu1 %4122, %v3148_v17   ;;  %469 = vperm.xlu0 %4121, %v3147_v18  }
  0x66   :  { %2018 = vperm.xlu1 %4122, %v3340_v19   ;;  %2013 = vperm.xlu0 %4121, %v3339_v20  }
  0x67   :  { %13 = vsyncpa [#allocation3], 0  ;;  %v3342_v23 = vld [vmem:[%s6144_s1 + $0x358] sm:$0xff]  ;;  %v3341_v24 = vld [vmem:[%s6144_s1 + $0x350] sm:$0xff]  ;;  %s4252_s25 = smov [#allocation2]  }
  0x68   :  { %v3152_v25 = vld [vmem:[%s6144_s1 + $0xe8] sm:$0xff]  ;;  %v3151_v26 = vld [vmem:[%s6144_s1 + $0xe0] sm:$0xff]  ;;  %v3154_v29 = vld [vmem:[%s6144_s1 + $0xf8] sm:$0xff]  ;;  %s3119_s26 = sshll.u32 %s4252_s25, 4  ;;  %s3120_s26 = int_to_ptr.vmem [resolvable:$true] %s3119_s26 }
  0x69   :  { %v3344_v27 = vld [vmem:[%s6144_s1 + $0x368] sm:$0xff]  ;;  %v3343_v28 = vld [vmem:[%s6144_s1 + $0x360] sm:$0xff]  ;;  %v3153_v30 = vld [vmem:[%s6144_s1 + $0xf0] sm:$0xff]  ;;  %s4227_s28 = scalar_lea.vmem %s3120_s26, 2048  ;;  %p4232_p1 = scmp.lt.s32.totalorder %s3120_s26, %s3120_s26 }
  0x6a   :  { %484 = vperm.xlu1 %4122, %v3150_v21   ;;  %479 = vperm.xlu0 %4121, %v3149_v22   ;;  %v4131_v31 = vld [vmem:[%s6147_s4 + $0x40] sm:$0xff]   ;;  %v3346_v32 = vld [vmem:[%s6144_s1 + $0x378] sm:$0xff]  ;;  %v3345_v33 = vld [vmem:[%s6144_s1 + $0x370] sm:$0xff]  ;;  %p4228_p0 = scmp.ne.s32.totalorder %s3120_s26, %s4227_s28  ;;  %p4233_p2 = scmp.lt.s32.totalorder %s4227_s28, %s4227_s28 }
  0x6b   :  { %3669 = vmatprep.subr.bf16.mxu0 %v4131_v31  ;;  %v4132_v34 = vld [vmem:[%s6147_s4 + $0xc0] sm:$0xff]   ;;  %v4133_v35 = vld [vmem:[%s6147_s4 + $0x48] sm:$0xff]   ;;  %v4135_v41 = vld [vmem:[%s6147_s4 + $0x50] sm:$0xff]  }
  0x6c   :  { %3670 = vmatpush3.bf16.msra.mxu0 %v4131_v31  ;;  %v275_v36 = vld [vmem:[%s6144_s1 + $0x8] sm:$0xff]  ;;  %v274_v37 = vld [vmem:[%s6144_s1] sm:$0xff]  ;;  %3765 = vmatprep.subr.bf16.mxu1 %v4132_v34  ;;  %v4136_v44 = vld [vmem:[%s6147_s4 + $0xd0] sm:$0xff]   ;;  %p4234_p3 = por %p4233_p2, %p4232_p1 }
  0x6d   :  { %3671 = vmatprep.subr.bf16.mxu0 %v4133_v35  ;;  %3766 = vmatpush3.bf16.msra.mxu1 %v4132_v34  ;;  %v4134_v38 = vld [vmem:[%s6147_s4 + $0xc8] sm:$0xff]   ;;  %v3371_v43 = vld [vmem:[%s6144_s1 + $0x380] sm:$0xff]  ;;  %v4137_v47 = vld [vmem:[%s6147_s4 + $0x58] sm:$0xff]  }
  0x6e   :  { %2028 = vperm.xlu1 %4122, %v3342_v23   ;;  %2023 = vperm.xlu0 %4121, %v3341_v24   ;;  %v3372_v42 = vld [vmem:[%s6144_s1 + $0x388] sm:$0xff]  ;;  %v277_v48 = vld [vmem:[%s6144_s1 + $0x18] sm:$0xff]  ;;  %v276_v49 = vld [vmem:[%s6144_s1 + $0x10] sm:$0xff]  ;;  %p4235_p4 = pnand %p4234_p3, %p4228_p0 }
  0x6f   :  { %3767 = vmatprep.subr.bf16.mxu1 %v4134_v38  ;;  %v4138_v50 = vld [vmem:[%s6147_s4 + $0xd8] sm:$0xff]   ;;  %v4139_v53 = vld [vmem:[%s6147_s4 + $0x60] sm:$0xff]   ;;  %v3373_v55 = vld [vmem:[%s6144_s1 + $0x390] sm:$0xff] }
  0x70   :  { %3672 = vmatpush3.bf16.msra.mxu0 %v4133_v35  ;;  %v3374_v54 = vld [vmem:[%s6144_s1 + $0x398] sm:$0xff]  ;;  %v4140_v56 = vld [vmem:[%s6147_s4 + $0xe0] sm:$0xff]   ;;  %v4141_v59 = vld [vmem:[%s6147_s4 + $0x68] sm:$0xff]  }
  0x71   :  { %3673 = vmatprep.subr.bf16.mxu0 %v4135_v41  ;;  %3768 = vmatpush3.bf16.msra.mxu1 %v4134_v38  ;;  %v279_v60 = vld [vmem:[%s6144_s1 + $0x28] sm:$0xff]  ;;  %v278_v61 = vld [vmem:[%s6144_s1 + $0x20] sm:$0xff]  ;;  %v4143_v1 = vld [vmem:[%s6147_s4 + $0x70] sm:$0xff]  }
  0x72   :  { %494 = vperm.xlu1 %4122, %v3152_v25   ;;  %489 = vperm.xlu0 %4121, %v3151_v26   ;;  %v4142_v62 = vld [vmem:[%s6147_s4 + $0xe8] sm:$0xff]   ;;  %v3375_v3 = vld [vmem:[%s6144_s1 + $0x3a0] sm:$0xff]  ;;  %v4144_v4 = vld [vmem:[%s6147_s4 + $0xf0] sm:$0xff]  }
  0x73   :  { %3769 = vmatprep.subr.bf16.mxu1 %v4136_v44  ;;  %v3376_v2 = vld [vmem:[%s6144_s1 + $0x3a8] sm:$0xff]  ;;  %v4145_v7 = vld [vmem:[%s6147_s4 + $0x78] sm:$0xff]   ;;  %v280_v9 = vld [vmem:[%s6144_s1 + $0x30] sm:$0xff] }
  0x74   :  { %3674 = vmatpush3.bf16.msra.mxu0 %v4135_v41  ;;  %v281_v8 = vld [vmem:[%s6144_s1 + $0x38] sm:$0xff]  ;;  %v3377_v14 = vld [vmem:[%s6144_s1 + $0x3b0] sm:$0xff]  ;;  %v4691_v15 = vld [vmem:[%s6147_s4] sm:$0xff]  }
  0x75   :  { %3675 = vmatprep.subr.bf16.mxu0 %v4137_v47  ;;  %3770 = vmatpush3.bf16.msra.mxu1 %v4136_v44  ;;  %v4146_v10 = vld [vmem:[%s6147_s4 + $0xf8] sm:$0xff]   ;;  %v4696_v16 = vld [vmem:[%s6147_s4 + $0x100] sm:$0xff]   ;;  %v283_v19 = vld [vmem:[%s6144_s1 + $0x48] sm:$0xff] }
  0x76   :  { %2038 = vperm.xlu1 %4122, %v3344_v27   ;;  %2033 = vperm.xlu0 %4121, %v3343_v28   ;;  %v3378_v13 = vld [vmem:[%s6144_s1 + $0x3b8] sm:$0xff]  ;;  %6207 = vst [vmem:[#allocation7_spill] sm:$0xff] %v4696_v16  ;;  %v282_v20 = vld [vmem:[%s6144_s1 + $0x40] sm:$0xff]  ;;  %v3380_v23 = vld [vmem:[%s6144_s1 + $0x3c8] sm:$0xff] }
  0x77   :  { %3771 = vmatprep.subr.bf16.mxu1 %v4138_v50  ;;  %v3379_v24 = vld [vmem:[%s6144_s1 + $0x3c0] sm:$0xff]  ;;  %v285_v27 = vld [vmem:[%s6144_s1 + $0x58] sm:$0xff]  ;;  %v284_v28 = vld [vmem:[%s6144_s1 + $0x50] sm:$0xff] }
  0x78   :  { %3676 = vmatpush3.bf16.msra.mxu0 %v4137_v47  ;;  %v3382_v31 = vld [vmem:[%s6144_s1 + $0x3d8] sm:$0xff]  ;;  %v287_v35 = vld [vmem:[%s6144_s1 + $0x68] sm:$0xff] }
  0x79   :  { %3677 = vmatprep.subr.bf16.mxu0 %v4139_v53  ;;  %3772 = vmatpush3.bf16.msra.mxu1 %v4138_v50  ;;  %v3384_v41 = vld [vmem:[%s6144_s1 + $0x3e8] sm:$0xff]  ;;  %v289_v47 = vld [vmem:[%s6144_s1 + $0x78] sm:$0xff] }
  0x7a   :  { %504 = vperm.xlu1 %4122, %v3154_v29   ;;  %499 = vperm.xlu0 %4121, %v3153_v30  }
  0x7b   :  { %3773 = vmatprep.subr.bf16.mxu1 %v4140_v56 }
  0x7c   :  { %3678 = vmatpush3.bf16.msra.mxu0 %v4139_v53  ;;  %v3386_v53 = vld [vmem:[%s6144_s1 + $0x3f8] sm:$0xff] }
  0x7d   :  { %3679 = vmatprep.subr.bf16.mxu0 %v4141_v59  ;;  %3774 = vmatpush3.bf16.msra.mxu1 %v4140_v56 }
  0x7e   :  { %2048 = vperm.xlu1 %4122, %v3346_v32   ;;  %2043 = vperm.xlu0 %4121, %v3345_v33   ;;  %v3381_v32 = vld [vmem:[%s6144_s1 + $0x3d0] sm:$0xff] }
  0x7f   :  { %3775 = vmatprep.subr.bf16.mxu1 %v4142_v62 }
  0x80   :  { %3680 = vmatpush3.bf16.msra.mxu0 %v4141_v59  ;;  %v3188_v59 = vld [vmem:[%s6144_s1 + $0x108] sm:$0xff] }
  0x81   :  { %v4582_v39 = vpop.permute.xlu1 %1199  ;;  %v4584_v40 = vpop.permute.xlu0 %1189  ;;  %3681 = vmatprep.subr.bf16.mxu0 %v4143_v1  ;;  %3776 = vmatpush3.bf16.msra.mxu1 %v4142_v62 }
  0x82   :  { %297 = vperm.xlu1 %4122, %v275_v36   ;;  %292 = vperm.xlu0 %4121, %v274_v37   ;;  %v286_v36 = vld [vmem:[%s6144_s1 + $0x60] sm:$0xff] }
  0x83   :  { %3777 = vmatprep.subr.bf16.mxu1 %v4144_v4 }
  0x84   :  { %3682 = vmatpush3.bf16.msra.mxu0 %v4143_v1  ;;  %v3412_v1 = vld [vmem:[%s6144_s1 + $0x408] sm:$0xff] }
  0x85   :  { %v4598_v45 = vpop.permute.xlu1 %1204  ;;  %v4600_v46 = vpop.permute.xlu0 %1194  ;;  %3683 = vmatprep.subr.bf16.mxu0 %v4145_v7  ;;  %3778 = vmatpush3.bf16.msra.mxu1 %v4144_v4 }
  0x86   :  { %2277 = vperm.xlu1 %4122, %v3372_v42   ;;  %2272 = vperm.xlu0 %4121, %v3371_v43   ;;  %v3383_v42 = vld [vmem:[%s6144_s1 + $0x3e0] sm:$0xff] }
  0x87   :  { %3779 = vmatprep.subr.bf16.mxu1 %v4146_v10 }
  0x88   :  { %3684 = vmatpush3.bf16.msra.mxu0 %v4145_v7  ;;  %v3190_v7 = vld [vmem:[%s6144_s1 + $0x118] sm:$0xff] }
  0x89   :  { %v4614_v51 = vpop.permute.xlu1 %1214  ;;  %v4616_v52 = vpop.permute.xlu0 %1209  ;;  %3780 = vmatpush3.bf16.msra.mxu1 %v4146_v10  ;;  %3701 = vmatprep.subr.bf16.mxu0 %v4691_v15 }
  0x8a   :  { %307 = vperm.xlu1 %4122, %v277_v48   ;;  %302 = vperm.xlu0 %4121, %v276_v49   ;;  %v288_v48 = vld [vmem:[%s6144_s1 + $0x70] sm:$0xff] }
  0x8b   :  { %3797 = vmatprep.subr.bf16.mxu1 %v4696_v16 }
  0x8d   :  { %v4630_v57 = vpop.permute.xlu1 %1224  ;;  %v4632_v58 = vpop.permute.xlu0 %1219 }
  0x8e   :  { %2287 = vperm.xlu1 %4122, %v3374_v54   ;;  %2282 = vperm.xlu0 %4121, %v3373_v55   ;;  %v3385_v54 = vld [vmem:[%s6144_s1 + $0x3f0] sm:$0xff] }
  0x91   :  { %v4646_v63 = vpop.permute.xlu1 %1234  ;;  %v4648_v0 = vpop.permute.xlu0 %1229 }
  0x92   :  { %317 = vperm.xlu1 %4122, %v279_v60   ;;  %312 = vperm.xlu0 %4121, %v278_v61   ;;  %v3187_v60 = vld [vmem:[%s6144_s1 + $0x100] sm:$0xff] }
  0x95   :  { %v4662_v5 = vpop.permute.xlu1 %1244  ;;  %v4664_v6 = vpop.permute.xlu0 %1239 }
  0x96   :  { %2297 = vperm.xlu1 %4122, %v3376_v2   ;;  %2292 = vperm.xlu0 %4121, %v3375_v3   ;;  %v3411_v2 = vld [vmem:[%s6144_s1 + $0x400] sm:$0xff] }
  0x99   :  { %v4678_v11 = vpop.permute.xlu1 %1254  ;;  %v4680_v12 = vpop.permute.xlu0 %1249 }
  0x9a   :  { %6205 = vst [vmem:[#allocation5_spill] sm:$0xff] %v4678_v11  ;;  %6206 = vst [vmem:[#allocation6_spill] sm:$0xff] %v4680_v12  ;;  %327 = vperm.xlu1 %4122, %v281_v8   ;;  %322 = vperm.xlu0 %4121, %v280_v9   ;;  %v3189_v8 = vld [vmem:[%s6144_s1 + $0x110] sm:$0xff] }
  0x9d   :  { %v4698_v17 = vpop.permute.xlu1 %1264  ;;  %v4700_v18 = vpop.permute.xlu0 %1259 }
  0x9e   :  { %6208 = vst [vmem:[#allocation8_spill] sm:$0xff] %v4698_v17  ;;  %6209 = vst [vmem:[#allocation9_spill] sm:$0xff] %v4700_v18  ;;  %2307 = vperm.xlu1 %4122, %v3378_v13   ;;  %2302 = vperm.xlu0 %4121, %v3377_v14   ;;  %v3414_v13 = vld [vmem:[%s6144_s1 + $0x418] sm:$0xff]  ;;  %v3413_v14 = vld [vmem:[%s6144_s1 + $0x410] sm:$0xff] }
  0xa1   :  { %v4710_v21 = vpop.permute.xlu1 %1679  ;;  %v4712_v22 = vpop.permute.xlu0 %1674 }
  0xa2   :  { %6210 = vst [vmem:[#allocation10_spill] sm:$0xff] %v4710_v21  ;;  %6211 = vst [vmem:[#allocation11_spill] sm:$0xff] %v4712_v22  ;;  %337 = vperm.xlu1 %4122, %v283_v19   ;;  %332 = vperm.xlu0 %4121, %v282_v20   ;;  %v3201_v21 = vld [vmem:[%s6144_s1 + $0x170] sm:$0xff] }
  0xa5   :  { %v4720_v25 = vpop.permute.xlu1 %1689  ;;  %v4722_v26 = vpop.permute.xlu0 %1684 }
  0xa6   :  { %6212 = vst [vmem:[#allocation12_spill] sm:$0xff] %v4720_v25  ;;  %6213 = vst [vmem:[#allocation13_spill] sm:$0xff] %v4722_v26  ;;  %2317 = vperm.xlu1 %4122, %v3380_v23   ;;  %2312 = vperm.xlu0 %4121, %v3379_v24   ;;  %v3192_v23 = vld [vmem:[%s6144_s1 + $0x128] sm:$0xff]  ;;  %v3191_v24 = vld [vmem:[%s6144_s1 + $0x120] sm:$0xff] }
  0xa9   :  { %v4730_v29 = vpop.permute.xlu1 %1699  ;;  %v4732_v30 = vpop.permute.xlu0 %1694 }
  0xaa   :  { %6214 = vst [vmem:[#allocation14_spill] sm:$0xff] %v4730_v29  ;;  %6215 = vst [vmem:[#allocation15_spill] sm:$0xff] %v4732_v30  ;;  %347 = vperm.xlu1 %4122, %v285_v27   ;;  %342 = vperm.xlu0 %4121, %v284_v28  }
  0xad   :  { %v4740_v33 = vpop.permute.xlu1 %1709  ;;  %v4742_v34 = vpop.permute.xlu0 %1704 }
  0xae   :  { %6216 = vst [vmem:[#allocation16_spill] sm:$0xff] %v4740_v33  ;;  %6217 = vst [vmem:[#allocation17_spill] sm:$0xff] %v4742_v34  ;;  %2327 = vperm.xlu1 %4122, %v3382_v31   ;;  %2322 = vperm.xlu0 %4121, %v3381_v32   ;;  %v3416_v31 = vld [vmem:[%s6144_s1 + $0x428] sm:$0xff]  ;;  %v3415_v32 = vld [vmem:[%s6144_s1 + $0x420] sm:$0xff] }
  0xb1   :  { %v4750_v37 = vpop.permute.xlu1 %1719  ;;  %v4752_v38 = vpop.permute.xlu0 %1714 }
  0xb2   :  { %6218 = vst [vmem:[#allocation18_spill] sm:$0xff] %v4750_v37  ;;  %6219 = vst [vmem:[#allocation19_spill] sm:$0xff] %v4752_v38  ;;  %357 = vperm.xlu1 %4122, %v287_v35   ;;  %352 = vperm.xlu0 %4121, %v286_v36  }
  0xb5   :  { %v4760_v43 = vpop.permute.xlu1 %1729  ;;  %v4762_v44 = vpop.permute.xlu0 %1724 }
  0xb6   :  { %6220 = vst [vmem:[#allocation20_spill] sm:$0xff] %v4760_v43  ;;  %6221 = vst [vmem:[#allocation21_spill] sm:$0xff] %v4762_v44  ;;  %2337 = vperm.xlu1 %4122, %v3384_v41   ;;  %2332 = vperm.xlu0 %4121, %v3383_v42   ;;  %v3194_v41 = vld [vmem:[%s6144_s1 + $0x138] sm:$0xff]  ;;  %v3193_v42 = vld [vmem:[%s6144_s1 + $0x130] sm:$0xff] }
  0xb7   :  { %v3202_v43 = vld [vmem:[%s6144_s1 + $0x178] sm:$0xff] }
  0xb9   :  { %v4770_v49 = vpop.permute.xlu1 %1739  ;;  %v4772_v50 = vpop.permute.xlu0 %1734 }
  0xba   :  { %6222 = vst [vmem:[#allocation22_spill] sm:$0xff] %v4770_v49  ;;  %6223 = vst [vmem:[#allocation23_spill] sm:$0xff] %v4772_v50  ;;  %367 = vperm.xlu1 %4122, %v289_v47   ;;  %362 = vperm.xlu0 %4121, %v288_v48  }
  0xbd   :  { %v4780_v55 = vpop.permute.xlu1 %1749  ;;  %v4782_v56 = vpop.permute.xlu0 %1744 }
  0xbe   :  { %6224 = vst [vmem:[#allocation24_spill] sm:$0xff] %v4780_v55  ;;  %6225 = vst [vmem:[#allocation25_spill] sm:$0xff] %v4782_v56  ;;  %2347 = vperm.xlu1 %4122, %v3386_v53   ;;  %2342 = vperm.xlu0 %4121, %v3385_v54   ;;  %v3418_v53 = vld [vmem:[%s6144_s1 + $0x438] sm:$0xff]  ;;  %v3417_v54 = vld [vmem:[%s6144_s1 + $0x430] sm:$0xff]  ;;  %v255_v55 = vlaneseq }
  0xbf   :  { %v3424_v56 = vld [vmem:[%s6144_s1 + $0x468] sm:$0xff] }
  0xc1   :  { %v4790_v61 = vpop.permute.xlu1 %434  ;;  %v4792_v62 = vpop.permute.xlu0 %429 }
  0xc2   :  { %895 = vperm.xlu1 %4122, %v3188_v59   ;;  %890 = vperm.xlu0 %4121, %v3187_v60  }
  0xc5   :  { %v4800_v3 = vpop.permute.xlu1 %1978  ;;  %v4802_v4 = vpop.permute.xlu0 %1973 }
  0xc6   :  { %2576 = vperm.xlu1 %4122, %v3412_v1   ;;  %2571 = vperm.xlu0 %4121, %v3411_v2   ;;  %v3196_v1 = vld [vmem:[%s6144_s1 + $0x148] sm:$0xff]  ;;  %v3195_v2 = vld [vmem:[%s6144_s1 + $0x140] sm:$0xff] }
  0xc9   :  { %v4810_v9 = vpop.permute.xlu1 %444  ;;  %v4812_v10 = vpop.permute.xlu0 %439 }
  0xca   :  { %905 = vperm.xlu1 %4122, %v3190_v7   ;;  %900 = vperm.xlu0 %4121, %v3189_v8  }
  0xcd   :  { %v4820_v19 = vpop.permute.xlu1 %1988  ;;  %v4822_v20 = vpop.permute.xlu0 %1983 }
  0xce   :  { %2586 = vperm.xlu1 %4122, %v3414_v13   ;;  %2581 = vperm.xlu0 %4121, %v3413_v14   ;;  %v3420_v13 = vld [vmem:[%s6144_s1 + $0x448] sm:$0xff]  ;;  %v3419_v14 = vld [vmem:[%s6144_s1 + $0x440] sm:$0xff] }
  0xd1   :  { %v4830_v27 = vpop.permute.xlu1 %454  ;;  %v4832_v28 = vpop.permute.xlu0 %449 }
  0xd2   :  { %915 = vperm.xlu1 %4122, %v3192_v23   ;;  %910 = vperm.xlu0 %4121, %v3191_v24  }
  0xd5   :  { %v4840_v35 = vpop.permute.xlu1 %1998  ;;  %v4842_v36 = vpop.permute.xlu0 %1993 }
  0xd6   :  { %2596 = vperm.xlu1 %4122, %v3416_v31   ;;  %2591 = vperm.xlu0 %4121, %v3415_v32   ;;  %v3198_v31 = vld [vmem:[%s6144_s1 + $0x158] sm:$0xff]  ;;  %v3197_v32 = vld [vmem:[%s6144_s1 + $0x150] sm:$0xff] }
  0xd9   :  { %v4850_v47 = vpop.permute.xlu1 %464  ;;  %v4852_v48 = vpop.permute.xlu0 %459 }
  0xda   :  { %925 = vperm.xlu1 %4122, %v3194_v41   ;;  %920 = vperm.xlu0 %4121, %v3193_v42  }
  0xdd   :  { %v4860_v59 = vpop.permute.xlu1 %2008  ;;  %v4862_v60 = vpop.permute.xlu0 %2003 }
  0xde   :  { %2606 = vperm.xlu1 %4122, %v3418_v53   ;;  %2601 = vperm.xlu0 %4121, %v3417_v54   ;;  %v3422_v53 = vld [vmem:[%s6144_s1 + $0x458] sm:$0xff]  ;;  %v3421_v54 = vld [vmem:[%s6144_s1 + $0x450] sm:$0xff] }
  0xe1   :  { %v4870_v7 = vpop.permute.xlu1 %474  ;;  %v4872_v8 = vpop.permute.xlu0 %469 }
  0xe2   :  { %935 = vperm.xlu1 %4122, %v3196_v1   ;;  %930 = vperm.xlu0 %4121, %v3195_v2  }
  0xe5   :  { %v4880_v23 = vpop.permute.xlu1 %2018  ;;  %v4882_v24 = vpop.permute.xlu0 %2013 }
  0xe6   :  { %6226 = vst [vmem:[#allocation26_spill] sm:$0xff] %v4882_v24  ;;  %2616 = vperm.xlu1 %4122, %v3420_v13   ;;  %2611 = vperm.xlu0 %4121, %v3419_v14   ;;  %v3200_v13 = vld [vmem:[%s6144_s1 + $0x168] sm:$0xff]  ;;  %v3199_v14 = vld [vmem:[%s6144_s1 + $0x160] sm:$0xff] }
  0xe9   :  { %v4890_v41 = vpop.permute.xlu1 %484  ;;  %v4892_v42 = vpop.permute.xlu0 %479 }
  0xea   :  { %945 = vperm.xlu1 %4122, %v3198_v31   ;;  %940 = vperm.xlu0 %4121, %v3197_v32  }
  0xed   :  { %v4900_v1 = vpop.permute.xlu1 %2028  ;;  %v4902_v2 = vpop.permute.xlu0 %2023 }
  0xee   :  { %6227 = vst [vmem:[#allocation27_spill] sm:$0xff] %v4900_v1  ;;  %6228 = vst [vmem:[#allocation28_spill] sm:$0xff] %v4902_v2  ;;  %2626 = vperm.xlu1 %4122, %v3422_v53   ;;  %2621 = vperm.xlu0 %4121, %v3421_v54   ;;  %v3423_v53 = vld [vmem:[%s6144_s1 + $0x460] sm:$0xff] }
  0xef   :  { %v4923_v54 = vld [vmem:[%s6146_s3] ss:$0 sm:$0xff] }
  0xf1   :  { %v4910_v31 = vpop.permute.xlu1 %494  ;;  %v4912_v32 = vpop.permute.xlu0 %489 }
  0xf2   :  { %955 = vperm.xlu1 %4122, %v3200_v13   ;;  %950 = vperm.xlu0 %4121, %v3199_v14  }
  0xf5   :  { %v4925_v49 = vpop.permute.xlu1 %2038  ;;  %v4927_v50 = vpop.permute.xlu0 %2033 }
  0xf6   :  { %6229 = vst [vmem:[#allocation29_spill] sm:$0xff] %v4925_v49  ;;  %6230 = vst [vmem:[#allocation30_spill] sm:$0xff] %v4927_v50  ;;  %2636 = vperm.xlu1 %4122, %v3424_v56   ;;  %2631 = vperm.xlu0 %4121, %v3423_v53   ;;  %v3655_v13 = vpop.f32.mrb[0].mxu0  ;;  %v4937_v49 = vshrl.u32 %v255_v55, 7 }
  0xf7   :  { %v169_v14 = vadd.f32 %v3655_v13, %v4923_v54  ;;  %v160_v44 = vpop.f32.mrb[1].mxu0 }
  0xf8   :  { %v161_v22 = vadd.f32 %v4923_v54, %v160_v44  ;;  %v3656_v1 = vpop.f32.mrb[2].mxu0  ;;  %vm257_vm0 = vcmp.lt.s32.totalorder %v4937_v49, 1  ;;  %vm854_vm1 = vcmp.lt.s32.totalorder %v4937_v49, 7 }
  0xf9   :  { %v4939_v50 = vmax.f32 %v169_v14, 0.0  ;;  %v172_v56 = vadd.f32 %v3656_v1, %v4923_v54  ;;  %v4942_v53 = vpop.permute.xlu1 %504  ;;  %v4944_v13 = vpop.permute.xlu0 %499  ;;  %v3426_v1 = vld [vmem:[%s6144_s1 + $0x478] sm:$0xff] }
  0xfa   :  { %v4946_v2 = vmax.f32 %v161_v22, 0.0  ;;  %v163_v24 = vpop.f32.mrb[3].mxu0  ;;  %965 = vperm.xlu1 %4122, %v3202_v43   ;;  %960 = vperm.xlu0 %4121, %v3201_v21   ;;  %v3425_v22 = vld [vmem:[%s6144_s1 + $0x470] sm:$0xff] }
  0xfb   :  { %6231 = vst [vmem:[#allocation31_spill] sm:$0xff] %v4939_v50  ;;  %v4950_v37 = vmul.f32 %v4810_v9, %v4939_v50  ;;  %v4952_v44 = vmax.f32 %v172_v56, 0.0  ;;  %v164_v55 = vadd.f32 %v4923_v54, %v163_v24  ;;  %v241_v14 = vrot.slane %v4939_v50, 7 }
  0xfd   :  { %v4963_v21 = vmax.f32 %v164_v55, 0.0  ;;  %v4965_v43 = vpop.permute.xlu1 %2048  ;;  %v4967_v9 = vpop.permute.xlu0 %2043  ;;  %v242_v24 = vrot.slane %v4952_v44, 7  ;;  %v4972_v56 = vmul.f32 %v4832_v28, %v4952_v44  ;;  %v4979_v55 = vmul.f32 %v4790_v61, %v4946_v2 }
  0xfe   :  { %6233 = vst [vmem:[#allocation33_spill] sm:$0xff] %v4965_v43  ;;  %6234 = vst [vmem:[#allocation34_spill] sm:$0xff] %v4967_v9  ;;  %2646 = vperm.xlu1 %4122, %v3426_v1   ;;  %2641 = vperm.xlu0 %4121, %v3425_v22   ;;  %v3659_v33 = vpop.f32.mrb[4].mxu0 }
  0xff   :  { %6232 = vst [vmem:[#allocation32_spill] sm:$0xff] %v4963_v21  ;;  %v4983_v43 = vmul.f32 %v4812_v10, %v4963_v21  ;;  %v185_v9 = vadd.f32 %v3659_v33, %v4923_v54  ;;  %v176_v28 = vpop.f32.mrb[5].mxu0  ;;  %v240_v29 = vrot.slane %v4963_v21, 7  ;;  %v4989_v1 = vsel %vm257_vm0, %v241_v14, %v242_v24 }
 0x100   :  { %v177_v22 = vadd.f32 %v4923_v54, %v176_v28  ;;  %v3660_v34 = vpop.f32.mrb[6].mxu0  ;;  %v4994_v61 = vmul.f32 %v4598_v45, %v4989_v1  ;;  %v4998_v10 = vmul.f32 %v4822_v20, %v4989_v1  ;;  %v6239_v45 = vrot.slane %v4946_v2, 7 }
 0x101   :  { %v5001_v38 = vmax.f32 %v185_v9, 0.0  ;;  %v188_v25 = vadd.f32 %v3660_v34, %v4923_v54  ;;  %v5004_v30 = vpop.permute.xlu1 %297  ;;  %v5006_v26 = vpop.permute.xlu0 %292  ;;  %v271_v28 = vsel %vm257_vm0, %v240_v29, %v241_v14 }
 0x102   :  { %6235 = vst [vmem:[#allocation35_spill] sm:$0xff] %v4994_v61  ;;  %6236 = vst [vmem:[#allocation36_spill] sm:$0xff] %v4998_v10  ;;  %v272_v18 = vsel %vm257_vm0, %v6239_v45, %v240_v29  ;;  %v5014_v20 = vmax.f32 %v177_v22, 0.0  ;;  %v179_v17 = vpop.f32.mrb[7].mxu0  ;;  %v5017_v9 = vmul.f32 %v4582_v39, %v271_v28  ;;  %v5020_v34 = vmul.f32 %v4800_v3, %v271_v28 }
 0x103   :  { %6237 = vst [vmem:[#allocation37_spill] sm:$0xff] %v5004_v30  ;;  %6238 = vst [vmem:[#allocation38_spill] sm:$0xff] %v5006_v26  ;;  %v5023_v33 = vmul.f32 %v4802_v4, %v272_v18  ;;  %v5025_v26 = vmax.f32 %v188_v25, 0.0  ;;  %v180_v14 = vadd.f32 %v4923_v54, %v179_v17  ;;  %v245_v16 = vrot.slane %v5001_v38, 7 }
 0x104   :  { %6240 = vst [vmem:[#allocation39_spill] sm:$0xff] %v5017_v9  ;;  %6241 = vst [vmem:[#allocation40_spill] sm:$0xff] %v5020_v34  ;;  %v243_v22 = vrot.slane %v5014_v20, 7  ;;  %v5034_v39 = vmul.f32 %v4830_v27, %v5014_v20  ;;  %v5037_v3 = vmul.f32 %v4600_v46, %v272_v18  ;;  %v5046_v29 = vmul.f32 %v4850_v47, %v5001_v38 }
 0x105   :  { %6242 = vst [vmem:[#allocation41_spill] sm:$0xff] %v5023_v33  ;;  %6243 = vst [vmem:[#allocation42_spill] sm:$0xff] %v5025_v26  ;;  %v5041_v4 = vmax.f32 %v180_v14, 0.0  ;;  %v2278_v17 = vpop.permute.xlu1 %2277  ;;  %v2273_v45 = vpop.permute.xlu0 %2272  ;;  %v246_v34 = vrot.slane %v5025_v26, 7  ;;  %v5050_v27 = vmul.f32 %v4872_v8, %v5025_v26 }
 0x106   :  { %v5053_v46 = vmul.f32 %v2278_v17, %v4939_v50  ;;  %v5056_v33 = vmul.f32 %v2273_v45, %v4963_v21  ;;  %v3663_v14 = vpop.f32.mrb[8].mxu0  ;;  %v269_v25 = vsel %vm257_vm0, %v242_v24, %v243_v22 }
 0x107   :  { %v201_v47 = vadd.f32 %v3663_v14, %v4923_v54  ;;  %v192_v11 = vpop.f32.mrb[9].mxu0  ;;  %v5064_v9 = vmul.f32 %v4616_v52, %v269_v25  ;;  %v5067_v8 = vmul.f32 %v4820_v19, %v269_v25  ;;  %v244_v17 = vrot.slane %v5041_v4, 7 }
 0x108   :  { %6244 = vst [vmem:[#allocation43_spill] sm:$0xff] %v5053_v46  ;;  %6245 = vst [vmem:[#allocation44_spill] sm:$0xff] %v5056_v33  ;;  %v193_v50 = vadd.f32 %v4923_v54, %v192_v11  ;;  %v3664_v24 = vpop.f32.mrb[10].mxu0  ;;  %v5075_v30 = vsel %vm257_vm0, %v245_v16, %v246_v34  ;;  %v5079_v14 = vmul.f32 %v4852_v48, %v5041_v4 }
 0x109   :  { %6246 = vst [vmem:[#allocation45_spill] sm:$0xff] %v5067_v8  ;;  %v5081_v52 = vmax.f32 %v201_v47, 0.0  ;;  %v204_v19 = vadd.f32 %v3664_v24, %v4923_v54  ;;  %v308_v26 = vpop.permute.xlu1 %307  ;;  %v303_v61 = vpop.permute.xlu0 %302  ;;  %v5088_v11 = vsel %vm257_vm0, %v244_v17, %v245_v16  ;;  %v5109_v16 = vsel %vm257_vm0, %v243_v22, %v244_v17 }
 0x10a   :  { %v5090_v33 = vmax.f32 %v193_v50, 0.0  ;;  %v5092_v46 = vmul.f32 %v308_v26, %v271_v28  ;;  %v5094_v21 = vmul.f32 %v303_v61, %v272_v18  ;;  %v195_v48 = vpop.f32.mrb[11].mxu0  ;;  %v5098_v47 = vmul.f32 %v4632_v58, %v5088_v11 }
 0x10b   :  { %v5100_v24 = vmax.f32 %v204_v19, 0.0  ;;  %v196_v12 = vadd.f32 %v4923_v54, %v195_v48  ;;  %v5105_v45 = vmul.f32 %v4840_v35, %v5088_v11  ;;  %v5115_v26 = vmul.f32 %v4614_v51, %v5109_v16 }
 0x10c   :  { %6247 = vst [vmem:[#allocation46_spill] sm:$0xff] %v5092_v46  ;;  %6248 = vst [vmem:[#allocation47_spill] sm:$0xff] %v5094_v21  ;;  %v5119_v58 = vmul.f32 %v4842_v36, %v5109_v16  ;;  %v247_v50 = vrot.slane %v5090_v33, 7  ;;  %v5126_v22 = vmul.f32 %v4630_v57, %v5075_v30  ;;  %v5130_v17 = vmul.f32 %v4862_v60, %v5075_v30 }
 0x10d   :  { %6249 = vst [vmem:[#allocation48_spill] sm:$0xff] %v5105_v45  ;;  %v5122_v61 = vmax.f32 %v196_v12, 0.0  ;;  %v2288_v35 = vpop.permute.xlu1 %2287  ;;  %v2283_v28 = vpop.permute.xlu0 %2282 }
 0x10e   :  { %6250 = vst [vmem:[#allocation49_spill] sm:$0xff] %v5119_v58  ;;  %6251 = vst [vmem:[#allocation50_spill] sm:$0xff] %v5130_v17  ;;  %v5135_v36 = vmul.f32 %v2288_v35, %v5014_v20  ;;  %v5138_v19 = vmul.f32 %v2283_v28, %v4952_v44  ;;  %v3667_v12 = vpop.f32.mrb[12].mxu0  ;;  %v5144_v57 = vsel %vm257_vm0, %v246_v34, %v247_v50  ;;  %v6323_v17 = vld [vmem:[#allocation30_spill] sm:$0xff] }
 0x10f   :  { %v217_v60 = vadd.f32 %v3667_v12, %v4923_v54  ;;  %v208_v18 = vpop.f32.mrb[13].mxu0  ;;  %v5149_v51 = vmul.f32 %v4648_v0, %v5144_v57  ;;  %v5153_v35 = vmul.f32 %v4860_v59, %v5144_v57  ;;  %v5157_v28 = vmul.f32 %v4870_v7, %v5090_v33 }
 0x110   :  { %6252 = vst [vmem:[#allocation51_spill] sm:$0xff] %v5135_v36  ;;  %6253 = vst [vmem:[#allocation52_spill] sm:$0xff] %v5138_v19  ;;  %v209_v34 = vadd.f32 %v4923_v54, %v208_v18  ;;  %v3668_v10 = vpop.f32.mrb[14].mxu0  ;;  %v248_v0 = vrot.slane %v5122_v61, 7 }
 0x111   :  { %6254 = vst [vmem:[#allocation53_spill] sm:$0xff] %v5153_v35  ;;  %v5165_v8 = vmax.f32 %v217_v60, 0.0  ;;  %v220_v59 = vadd.f32 %v3668_v10, %v4923_v54  ;;  %v318_v21 = vpop.permute.xlu1 %317  ;;  %v313_v46 = vpop.permute.xlu0 %312  ;;  %v249_v35 = vrot.slane %v5081_v52, 7 }
 0x112   :  { %v5171_v48 = vmax.f32 %v209_v34, 0.0  ;;  %v5173_v18 = vmul.f32 %v318_v21, %v269_v25  ;;  %v5176_v19 = vmul.f32 %v313_v46, %v4989_v1  ;;  %v211_v12 = vpop.f32.mrb[15].mxu0  ;;  %v5180_v60 = vsel %vm257_vm0, %v247_v50, %v248_v0 }
 0x113   :  { %v5182_v10 = vmax.f32 %v220_v59, 0.0  ;;  %v212_v36 = vadd.f32 %v4923_v54, %v211_v12  ;;  %v5187_v7 = vmul.f32 %v4646_v63, %v5180_v60  ;;  %v5191_v21 = vsel %vm257_vm0, %v248_v0, %v249_v35 }
 0x114   :  { %6255 = vst [vmem:[#allocation54_spill] sm:$0xff] %v5173_v18  ;;  %6256 = vst [vmem:[#allocation55_spill] sm:$0xff] %v5176_v19  ;;  %v5197_v25 = vmul.f32 %v4664_v6, %v5191_v21  ;;  %v5201_v46 = vmul.f32 %v4880_v23, %v5191_v21  ;;  %v5205_v54 = vmul.f32 %v4892_v42, %v5122_v61  ;;  %v6260_v1 = vrot.slane %v4946_v2, 7 }
 0x115   :  { %v5207_v63 = vmax.f32 %v212_v36, 0.0  ;;  %v2298_v50 = vpop.permute.xlu1 %2297  ;;  %v2293_v34 = vpop.permute.xlu0 %2292  ;;  %v507_v12 = vmul.f32 %v4792_v62, %v5182_v10  ;;  %v254_v0 = vrot.slane %v5182_v10, 7  ;;  %v5222_v42 = vmul.f32 %v4890_v41, %v5081_v52 }
 0x116   :  { %6257 = vst [vmem:[#allocation56_spill] sm:$0xff] %v5201_v46  ;;  %v5215_v59 = vmul.f32 %v2298_v50, %v5001_v38  ;;  %v5218_v23 = vmul.f32 %v2293_v34, %v5041_v4  ;;  %v5226_v36 = vmul.f32 %v4912_v32, %v5100_v24  ;;  %v5237_v50 = vmul.f32 %v4910_v31, %v5171_v48 }
 0x117   :  { %v523_v62 = vpack.c.bf16 %v4979_v55, %v507_v12  ;;  %v5233_v6 = vsel %vm257_vm0, %v254_v0, %v6260_v1  ;;  %v250_v34 = vrot.slane %v5100_v24, 7  ;;  %v4149_v55 = vld [vmem:[%s6147_s4 + $0x8] sm:$0xff]   ;;  %v251_v12 = vrot.slane %v5171_v48, 7 }
 0x118   :  { %6258 = vst [vmem:[#allocation57_spill] sm:$0xff] %v5215_v59  ;;  %6259 = vst [vmem:[#allocation58_spill] sm:$0xff] %v5218_v23  ;;  %v1267_v32 = vmul.f32 %v4584_v40, %v5233_v6  ;;  %v252_v40 = vrot.slane %v5207_v63, 7  ;;  %v5259_v23 = vmul.f32 %v4944_v13, %v5207_v63  ;;  %v6265_v13 = vpack.c.bf16 %v5034_v39, %v4972_v56  ;;  %v4151_v39 = vld [vmem:[%s6147_s4 + $0x10] sm:$0xff]  }
 0x119   :  { %6261 = vst [vmem:[#allocation59_spill] sm:$0xff] %v5233_v6  ;;  %v328_v19 = vpop.permute.xlu1 %327  ;;  %v323_v31 = vpop.permute.xlu0 %322  ;;  %3685 = vmatprep.mubr.bf16.mxu0 %v523_v62  ;;  %v5254_v41 = vsel %vm257_vm0, %v249_v35, %v250_v34  ;;  %v6264_v62 = vpack.c.bf16 %v4950_v37, %v4983_v43  ;;  %v5288_v43 = vsel %vm257_vm0, %v250_v34, %v251_v12  ;;  %v253_v56 = vrot.slane %v5165_v8, 7 }
 0x11a   :  { %v5262_v1 = vmul.f32 %v328_v19, %v5088_v11  ;;  %v5265_v59 = vmul.f32 %v323_v31, %v5109_v16  ;;  %v1283_v18 = vpack.c.bf16 %v5037_v3, %v1267_v32  ;;  %v5273_v35 = vmul.f32 %v4662_v5, %v5254_v41  ;;  %v4150_v11 = vld [vmem:[%s6147_s4 + $0x108] sm:$0xff]   ;;  %v6268_v31 = vld [vmem:[#allocation35_spill] sm:$0xff] }
 0x11b   :  { %3686 = vmatmul.mubr.bf16.vlgmr.msra.gmra.mrb[16].mxu0 %v6264_v62  ;;  %v5284_v37 = vsel %vm257_vm0, %v251_v12, %v252_v40  ;;  %v5292_v5 = vmul.f32 %v4942_v53, %v5165_v8  ;;  %v6266_v16 = vld [vmem:[#allocation6_spill] sm:$0xff]  ;;  %v6267_v53 = vld [vmem:[#allocation32_spill] sm:$0xff]  ;;  %v6269_v62 = vld [vmem:[#allocation39_spill] sm:$0xff]  ;;  %v5318_v3 = vsel %vm257_vm0, %v253_v56, %v254_v0  ;;  %v6286_v46 = vpack.c.bf16 %v5046_v29, %v5079_v14 }
 0x11c   :  { %6262 = vst [vmem:[#allocation60_spill] sm:$0xff] %v5262_v1  ;;  %6263 = vst [vmem:[#allocation61_spill] sm:$0xff] %v5265_v59  ;;  %3689 = vmatprep.mubr.bf16.mxu0 %v6265_v13  ;;  %3702 = vmatpush3.bf16.msra.mxu0 %v4691_v15  ;;  %v5304_v19 = vmul.f32 %v6266_v16, %v5288_v43  ;;  %v6270_v13 = vpack.c.bf16 %v6268_v31, %v6269_v62  ;;  %v6273_v16 = vld [vmem:[#allocation37_spill] sm:$0xff]  ;;  %v6275_v31 = vld [vmem:[#allocation42_spill] sm:$0xff] }
 0x11d   :  { %3781 = vmatprep.mubr.bf16.mxu1 %v1283_v18  ;;  %3703 = vmatprep.subr.bf16.mxu0 %v4149_v55  ;;  %v2308_v32 = vpop.permute.xlu1 %2307  ;;  %v2303_v12 = vpop.permute.xlu0 %2302  ;;  %v6271_v18 = vld [vmem:[#allocation5_spill] sm:$0xff]  ;;  %6272 = vst [vmem:[#allocation6_spill] sm:$0xff] %v5318_v3  ;;  %v5322_v34 = vmul.f32 %v6273_v16, %v5233_v6  ;;  %v6279_v59 = vld [vmem:[#allocation38_spill] sm:$0xff]  ;;  %v6281_v16 = vld [vmem:[#allocation8_spill] sm:$0xff]  ;;  %v6285_v6 = vrot.slane %v6267_v53, 1 }
 0x11e   :  { %3782 = vmatmul.mubr.bf16.vlgmr.msra.gmra.mrb[0].mxu1 %v6270_v13  ;;  %v5312_v15 = vmul.f32 %v6271_v18, %v5284_v37  ;;  %v5325_v1 = vmul.f32 %v2308_v32, %v5090_v33  ;;  %v5328_v62 = vmul.f32 %v2303_v12, %v6275_v31  ;;  %v6277_v13 = vld [vmem:[#allocation7_spill] sm:$0xff]  ;;  %v6278_v18 = vpack.c.bf16 %v5115_v26, %v5064_v9  ;;  %v4155_v14 = vld [vmem:[%s6147_s4 + $0x20] sm:$0xff]  }
 0x11f   :  { %3798 = vmatpush3.bf16.msra.mxu1 %v6277_v13  ;;  %v5336_v0 = vmul.f32 %v6279_v59, %v5318_v3  ;;  %v5343_v12 = vsel %vm257_vm0, %v252_v40, %v253_v56  ;;  %v5347_v13 = vmul.f32 %v6281_v16, %v5318_v3  ;;  %v6282_v9 = vld [vmem:[#allocation31_spill] sm:$0xff]  ;;  %v6283_v56 = vld [vmem:[#allocation9_spill] sm:$0xff] }
 0x120   :  { %6274 = vst [vmem:[#allocation32_spill] sm:$0xff] %v5325_v1  ;;  %6276 = vst [vmem:[#allocation35_spill] sm:$0xff] %v5328_v62  ;;  %3785 = vmatprep.mubr.bf16.mxu1 %v6278_v18  ;;  %3704 = vmatpush3.bf16.msra.mxu0 %v4149_v55  ;;  %v840_v26 = vrot.slane %v6282_v9, 1  ;;  %v4152_v55 = vld [vmem:[%s6147_s4 + $0x110] sm:$0xff]   ;;  %v4153_v18 = vld [vmem:[%s6147_s4 + $0x18] sm:$0xff]   ;;  %v5362_v16 = vmul.f32 %v6283_v56, %v5343_v12  ;;  %v6284_v1 = vrot.slane %v4952_v44, 1 }
 0x121   :  { %3799 = vmatprep.subr.bf16.mxu1 %v4150_v11  ;;  %6280 = vst [vmem:[#allocation39_spill] sm:$0xff] %v5343_v12  ;;  %3705 = vmatprep.subr.bf16.mxu0 %v4151_v39  ;;  %v338_v59 = vpop.permute.xlu1 %337  ;;  %v333_v62 = vpop.permute.xlu0 %332  ;;  %v842_v56 = vrot.slane %v5014_v20, 1  ;;  %v843_v12 = vrot.slane %v5041_v4, 1 }
 0x122   :  { %v5370_v9 = vsel %vm854_vm1, %v840_v26, %v6284_v1  ;;  %v5376_v40 = vsel %vm854_vm1, %v6285_v6, %v840_v26  ;;  %v5380_v3 = vmul.f32 %v338_v59, %v5144_v57  ;;  %v5383_v32 = vmul.f32 %v333_v62, %v5075_v30  ;;  %v4154_v30 = vld [vmem:[%s6147_s4 + $0x118] sm:$0xff]   ;;  %v6288_v57 = vld [vmem:[#allocation13_spill] sm:$0xff] }
 0x123   :  { %3800 = vmatpush3.bf16.msra.mxu1 %v4150_v11  ;;  %3690 = vmatmul.mubr.bf16.gmra.mrb[20].mxu0 %v6286_v46  ;;  %v6287_v6 = vpack.c.bf16 %v5157_v28, %v5050_v27  ;;  %v5399_v11 = vmul.f32 %v6288_v57, %v5370_v9  ;;  %v844_v28 = vrot.slane %v5001_v38, 1  ;;  %v845_v46 = vrot.slane %v6275_v31, 1 }
 0x124   :  { %3706 = vmatpush3.bf16.msra.mxu0 %v4151_v39  ;;  %3801 = vmatprep.subr.bf16.mxu1 %v4152_v55  ;;  %v6290_v26 = vpack.c.bf16 %v5126_v22, %v5098_v47  ;;  %v6292_v57 = vmov %v6284_v1  ;;  %v6296_v22 = vpack.c.bf16 %v5187_v7, %v5149_v51  ;;  %v847_v51 = vrot.slane %v5122_v61, 1 }
 0x125   :  { %3693 = vmatprep.mubr.bf16.mxu0 %v6287_v6  ;;  %6289 = vst [vmem:[#allocation5_spill] sm:$0xff] %v5399_v11  ;;  %3707 = vmatprep.subr.bf16.mxu0 %v4153_v18  ;;  %v2318_v39 = vpop.permute.xlu1 %2317  ;;  %v2313_v62 = vpop.permute.xlu0 %2312  ;;  %v5417_v6 = vsel %vm854_vm1, %v842_v56, %v843_v12  ;;  %v5423_v27 = vsel %vm854_vm1, %v6292_v57, %v842_v56  ;;  %v846_v56 = vrot.slane %v5090_v33, 1  ;;  %v6299_v57 = vld [vmem:[#allocation12_spill] sm:$0xff] }
 0x126   :  { %3786 = vmatmul.mubr.bf16.gmra.mrb[4].mxu1 %v6290_v26  ;;  %6291 = vst [vmem:[#allocation37_spill] sm:$0xff] %v5417_v6  ;;  %6293 = vst [vmem:[#allocation42_spill] sm:$0xff] %v5423_v27  ;;  %v5428_v1 = vmul.f32 %v2318_v39, %v5081_v52  ;;  %v5431_v47 = vmul.f32 %v2313_v62, %v5122_v61  ;;  %v6297_v26 = vld [vmem:[#allocation15_spill] sm:$0xff]  ;;  %v5443_v39 = vmul.f32 %v6299_v57, %v5423_v27 }
 0x127   :  { %3802 = vmatpush3.bf16.msra.mxu1 %v4152_v55  ;;  %3789 = vmatprep.mubr.bf16.mxu1 %v6296_v22  ;;  %v5438_v59 = vmul.f32 %v6297_v26, %v5417_v6  ;;  %v5449_v55 = vsel %vm854_vm1, %v844_v28, %v845_v46  ;;  %v4157_v22 = vld [vmem:[%s6147_s4 + $0x28] sm:$0xff]   ;;  %v5462_v26 = vsel %vm854_vm1, %v843_v12, %v844_v28 }
 0x128   :  { %6294 = vst [vmem:[#allocation7_spill] sm:$0xff] %v5428_v1  ;;  %6295 = vst [vmem:[#allocation38_spill] sm:$0xff] %v5431_v47  ;;  %3708 = vmatpush3.bf16.msra.mxu0 %v4153_v18  ;;  %3803 = vmatprep.subr.bf16.mxu1 %v4154_v30  ;;  %v4156_v18 = vld [vmem:[%s6147_s4 + $0x120] sm:$0xff]   ;;  %v6300_v1 = vld [vmem:[#allocation14_spill] sm:$0xff]  ;;  %v5475_v6 = vsel %vm854_vm1, %v846_v56, %v847_v51  ;;  %v6302_v57 = vpack.c.bf16 %v5222_v42, %v5205_v54  ;;  %v849_v42 = vrot.slane %v5100_v24, 1 }
 0x129   :  { %6298 = vst [vmem:[#allocation8_spill] sm:$0xff] %v5438_v59  ;;  %3709 = vmatprep.subr.bf16.mxu0 %v4155_v14  ;;  %v348_v62 = vpop.permute.xlu1 %347  ;;  %v343_v29 = vpop.permute.xlu0 %342  ;;  %v5471_v27 = vmul.f32 %v6300_v1, %v5462_v26  ;;  %v6303_v47 = vld [vmem:[#allocation19_spill] sm:$0xff]  ;;  %v848_v1 = vrot.slane %v5081_v52, 1  ;;  %v6304_v11 = vpack.c.bf16 %v5237_v50, %v5226_v36  ;;  %v6308_v54 = vld [vmem:[#allocation17_spill] sm:$0xff]  ;;  %v6309_v59 = vld [vmem:[#allocation18_spill] sm:$0xff] }
 0x12a   :  { %v5478_v12 = vmul.f32 %v348_v62, %v5191_v21  ;;  %v5481_v28 = vmul.f32 %v343_v29, %v5180_v60  ;;  %v5488_v7 = vmul.f32 %v6303_v47, %v5475_v6  ;;  %v4158_v21 = vld [vmem:[%s6147_s4 + $0x128] sm:$0xff]   ;;  %v850_v29 = vrot.slane %v5171_v48, 1  ;;  %v4159_v50 = vld [vmem:[%s6147_s4 + $0x30] sm:$0xff]  }
 0x12b   :  { %6301 = vst [vmem:[#allocation9_spill] sm:$0xff] %v5471_v27  ;;  %3804 = vmatpush3.bf16.msra.mxu1 %v4154_v30  ;;  %3694 = vmatmul.mubr.bf16.gmra.mrb[24].mxu0 %v6302_v57  ;;  %v5499_v30 = vsel %vm854_vm1, %v845_v46, %v846_v56  ;;  %v5516_v46 = vsel %vm854_vm1, %v847_v51, %v848_v1  ;;  %v851_v47 = vrot.slane %v5207_v63, 1 }
 0x12c   :  { %3697 = vmatprep.mubr.bf16.mxu0 %v6304_v11  ;;  %3710 = vmatpush3.bf16.msra.mxu0 %v4155_v14  ;;  %6305 = vst [vmem:[#allocation13_spill] sm:$0xff] %v5499_v30  ;;  %v6306_v11 = vld [vmem:[#allocation16_spill] sm:$0xff]  ;;  %v6307_v57 = vpack.c.bf16 %v5273_v35, %v5197_v25  ;;  %v5524_v36 = vmul.f32 %v6308_v54, %v5449_v55  ;;  %v6322_v54 = vld [vmem:[#allocation27_spill] sm:$0xff] }
 0x12d   :  { %3805 = vmatprep.subr.bf16.mxu1 %v4156_v18  ;;  %3711 = vmatprep.subr.bf16.mxu0 %v4157_v22  ;;  %v5512_v14 = vmul.f32 %v6306_v11, %v5499_v30  ;;  %v2328_v56 = vpop.permute.xlu1 %2327  ;;  %v2323_v62 = vpop.permute.xlu0 %2322  ;;  %v5528_v11 = vsel %vm854_vm1, %v848_v1, %v849_v42  ;;  %v5532_v51 = vmul.f32 %v6309_v59, %v5516_v46  ;;  %v852_v1 = vrot.slane %v5165_v8, 1  ;;  %v6355_v49 = vld [vmem:[#allocation37_spill] sm:$0xff] }
 0x12e   :  { %3790 = vmatmul.mubr.bf16.gmra.mrb[8].mxu1 %v6307_v57  ;;  %v5536_v27 = vsel %vm854_vm1, %v849_v42, %v850_v29  ;;  %v5539_v30 = vmul.f32 %v2328_v56, %v5171_v48  ;;  %v5542_v25 = vmul.f32 %v2323_v62, %v5100_v24  ;;  %v6312_v35 = vpack.c.bf16 %v5312_v15, %v5304_v19  ;;  %v4160_v15 = vld [vmem:[%s6147_s4 + $0x130] sm:$0xff]   ;;  %v4161_v19 = vld [vmem:[%s6147_s4 + $0x38] sm:$0xff]  }
 0x12f   :  { %3806 = vmatpush3.bf16.msra.mxu1 %v4156_v18  ;;  %v5554_v42 = vsel %vm854_vm1, %v850_v29, %v851_v47  ;;  %v6313_v29 = vrot.slane %v5182_v10, 1  ;;  %v6315_v18 = vld [vmem:[#allocation40_spill] sm:$0xff] }
 0x130   :  { %6310 = vst [vmem:[#allocation15_spill] sm:$0xff] %v5539_v30  ;;  %6311 = vst [vmem:[#allocation12_spill] sm:$0xff] %v5542_v25  ;;  %3793 = vmatprep.mubr.bf16.mxu1 %v6312_v35  ;;  %3712 = vmatpush3.bf16.msra.mxu0 %v4157_v22  ;;  %v5566_v22 = vsel %vm854_vm1, %v851_v47, %v852_v1  ;;  %v6314_v35 = vld [vmem:[#allocation41_spill] sm:$0xff]  ;;  %v6316_v30 = vpack.c.bf16 %v5292_v5, %v5259_v23 }
 0x131   :  { %3807 = vmatprep.subr.bf16.mxu1 %v4158_v21  ;;  %3713 = vmatprep.subr.bf16.mxu0 %v4159_v50  ;;  %v358_v56 = vpop.permute.xlu1 %357  ;;  %v353_v62 = vpop.permute.xlu0 %352  ;;  %v5572_v57 = vsel %vm854_vm1, %v852_v1, %v6313_v29  ;;  %v6317_v1 = vpack.c.bf16 %v5322_v34, %v5336_v0  ;;  %v4162_v29 = vld [vmem:[%s6147_s4 + $0x138] sm:$0xff]   ;;  %v1469_v23 = vpack.c.bf16 %v6267_v53, %v4946_v2  ;;  %v4163_v5 = vld [vmem:[%s6147_s4 + $0x80] sm:$0xff]   ;;  %v6319_v34 = vld [vmem:[#allocation26_spill] sm:$0xff] }
 0x132   :  { %v5579_v25 = vmul.f32 %v358_v56, %v5288_v43  ;;  %v5582_v47 = vmul.f32 %v353_v62, %v5254_v41  ;;  %v5604_v0 = vmul.f32 %v6319_v34, %v5180_v60  ;;  %v5615_v62 = vmul.f32 %v6322_v54, %v5288_v43  ;;  %v6325_v60 = vld [vmem:[#allocation39_spill] sm:$0xff]  ;;  %v6326_v34 = vld [vmem:[#allocation29_spill] sm:$0xff]  ;;  %v6331_v54 = vld [vmem:[#allocation6_spill] sm:$0xff] }
 0x133   :  { %3808 = vmatpush3.bf16.msra.mxu1 %v4158_v21  ;;  %3698 = vmatmul.mubr.bf16.gmra.mrb[28].mxu0 %v6316_v30  ;;  %v5619_v56 = vmul.f32 %v6323_v17, %v5284_v37  ;;  %v5623_v58 = vmul.f32 %v6326_v34, %v6325_v60  ;;  %v6336_v43 = vld [vmem:[#allocation47_spill] sm:$0xff] }
 0x134   :  { %3714 = vmatpush3.bf16.msra.mxu0 %v4159_v50  ;;  %3717 = vmatprep.mubr.bf16.mxu0 %v6317_v1  ;;  %v6320_v50 = vpack.c.bf16 %v5347_v13, %v5362_v16  ;;  %v6321_v1 = vld [vmem:[#allocation28_spill] sm:$0xff] }
 0x135   :  { %3809 = vmatprep.subr.bf16.mxu1 %v4160_v15  ;;  %3715 = vmatprep.subr.bf16.mxu0 %v4161_v19  ;;  %v2338_v21 = vpop.permute.xlu1 %2337  ;;  %v2333_v30 = vpop.permute.xlu0 %2332  ;;  %v5611_v59 = vmul.f32 %v6321_v1, %v5254_v41  ;;  %6324 = vst [vmem:[#allocation14_spill] sm:$0xff] %v5619_v56  ;;  %6327 = vst [vmem:[#allocation19_spill] sm:$0xff] %v5623_v58  ;;  %v6330_v41 = vld [vmem:[#allocation56_spill] sm:$0xff]  ;;  %v6334_v1 = vld [vmem:[#allocation33_spill] sm:$0xff] }
 0x136   :  { %3794 = vmatmul.mubr.bf16.gmra.mrb[12].mxu1 %v6320_v50  ;;  %v5626_v45 = vmul.f32 %v2338_v21, %v5165_v8  ;;  %v5629_v13 = vmul.f32 %v2333_v30, %v5207_v63  ;;  %v6332_v50 = vld [vmem:[#allocation34_spill] sm:$0xff]  ;;  %v6339_v58 = vld [vmem:[#allocation55_spill] sm:$0xff] }
 0x137   :  { %3810 = vmatpush3.bf16.msra.mxu1 %v4160_v15  ;;  %3813 = vmatprep.mubr.bf16.mxu1 %v1469_v23  ;;  %v5639_v21 = vmul.f32 %v6332_v50, %v6331_v54  ;;  %v4164_v15 = vld [vmem:[%s6147_s4 + $0x140] sm:$0xff]   ;;  %v6333_v23 = vld [vmem:[#allocation59_spill] sm:$0xff]  ;;  %v6335_v30 = vld [vmem:[#allocation46_spill] sm:$0xff] }
 0x138   :  { %6328 = vst [vmem:[#allocation16_spill] sm:$0xff] %v5626_v45  ;;  %6329 = vst [vmem:[#allocation17_spill] sm:$0xff] %v5629_v13  ;;  %3716 = vmatpush3.bf16.msra.mxu0 %v4161_v19  ;;  %3811 = vmatprep.subr.bf16.mxu1 %v4162_v29  ;;  %v4165_v19 = vld [vmem:[%s6147_s4 + $0x88] sm:$0xff]   ;;  %v5651_v34 = vmul.f32 %v6334_v1, %v6333_v23  ;;  %v6337_v13 = vpack.c.bf16 %v6335_v30, %v6336_v43  ;;  %v4169_v1 = vld [vmem:[%s6147_s4 + $0x98] sm:$0xff]  }
 0x139   :  { %3733 = vmatprep.subr.bf16.mxu0 %v4163_v5  ;;  %v368_v16 = vpop.permute.xlu1 %367  ;;  %v363_v17 = vpop.permute.xlu0 %362  ;;  %v6338_v56 = vld [vmem:[#allocation54_spill] sm:$0xff] }
 0x13a   :  { %v5654_v54 = vmul.f32 %v368_v16, %v6325_v60  ;;  %v5657_v50 = vmul.f32 %v363_v17, %v5284_v37  ;;  %v2074_v45 = vpack.c.bf16 %v5651_v34, %v5639_v21  ;;  %v6340_v23 = vpack.c.bf16 %v6338_v56, %v6339_v58  ;;  %v4166_v60 = vld [vmem:[%s6147_s4 + $0x148] sm:$0xff]   ;;  %v6341_v17 = vld [vmem:[#allocation31_spill] sm:$0xff] }
 0x13b   :  { %3812 = vmatpush3.bf16.msra.mxu1 %v4162_v29  ;;  %3718 = vmatmul.mubr.bf16.vlgmr.msra.gmra.mrb[16].mxu0 %v6337_v13  ;;  %v4167_v29 = vld [vmem:[%s6147_s4 + $0x90] sm:$0xff]   ;;  %v6342_v58 = vpack.c.bf16 %v4952_v44, %v6341_v17  ;;  %v6343_v16 = vpack.c.bf16 %v5041_v4, %v5014_v20  ;;  %v6345_v20 = vld [vmem:[#allocation61_spill] sm:$0xff]  ;;  %v6397_v34 = vld [vmem:[#allocation58_spill] sm:$0xff] }
 0x13c   :  { %3721 = vmatprep.mubr.bf16.mxu0 %v6340_v23  ;;  %3734 = vmatpush3.bf16.msra.mxu0 %v4163_v5  ;;  %v393_v37 = vpack.c.bf16 %v5654_v54, %v5657_v50  ;;  %v4168_v44 = vld [vmem:[%s6147_s4 + $0x150] sm:$0xff]   ;;  %v4171_v17 = vld [vmem:[%s6147_s4 + $0xa0] sm:$0xff]  }
 0x13d   :  { %3829 = vmatprep.subr.bf16.mxu1 %v4164_v15  ;;  %3735 = vmatprep.subr.bf16.mxu0 %v4165_v19  ;;  %v2348_v13 = vpop.permute.xlu1 %2347  ;;  %v2343_v43 = vpop.permute.xlu0 %2342  ;;  %v4179_v50 = vld [vmem:[%s6147_s4 + $0x180] sm:$0xff]  }
 0x13e   :  { %3814 = vmatmul.mubr.bf16.vlgmr.msra.gmra.mrb[0].mxu1 %v6342_v58  ;;  %v5679_v56 = vmul.f32 %v2348_v13, %v4946_v2  ;;  %v5682_v5 = vmul.f32 %v2343_v43, %v5182_v10  ;;  %v6344_v13 = vld [vmem:[#allocation60_spill] sm:$0xff] }
 0x13f   :  { %3830 = vmatpush3.bf16.msra.mxu1 %v4164_v15  ;;  %3817 = vmatprep.mubr.bf16.mxu1 %v6343_v16  ;;  %v6346_v4 = vpack.c.bf16 %v6344_v13, %v6345_v20  ;;  %v4170_v43 = vld [vmem:[%s6147_s4 + $0x158] sm:$0xff]   ;;  %v6348_v16 = vpack.c.bf16 %v6275_v31, %v5001_v38  ;;  %v4172_v38 = vld [vmem:[%s6147_s4 + $0x160] sm:$0xff]   ;;  %v4173_v31 = vld [vmem:[%s6147_s4 + $0xa8] sm:$0xff]  }
 0x140   :  { %3736 = vmatpush3.bf16.msra.mxu0 %v4165_v19  ;;  %3831 = vmatprep.subr.bf16.mxu1 %v4166_v60  ;;  %v2373_v30 = vpack.c.bf16 %v5679_v56, %v5682_v5  ;;  %v6347_v19 = vpack.c.bf16 %v5380_v3, %v5383_v32 }
 0x141   :  { %3737 = vmatprep.subr.bf16.mxu0 %v4167_v29  ;;  %v896_v23 = vpop.permute.xlu1 %895  ;;  %v891_v15 = vpop.permute.xlu0 %890 }
 0x143   :  { %3832 = vmatpush3.bf16.msra.mxu1 %v4166_v60  ;;  %3722 = vmatmul.mubr.bf16.gmra.mrb[20].mxu0 %v6346_v4  ;;  %v838_v4 = vrot.slane %v4946_v2, 1  ;;  %v6352_v2 = vrot.slane %v6267_v53, 1 }
 0x144   :  { %3725 = vmatprep.mubr.bf16.mxu0 %v6347_v19  ;;  %3738 = vmatpush3.bf16.msra.mxu0 %v4167_v29  ;;  %v6349_v29 = vpack.c.bf16 %v5122_v61, %v5090_v33  ;;  %v6351_v19 = vpack.c.bf16 %v5579_v25, %v5582_v47  ;;  %v4175_v25 = vld [vmem:[%s6147_s4 + $0xb0] sm:$0xff]  }
 0x145   :  { %3833 = vmatprep.subr.bf16.mxu1 %v4168_v44  ;;  %3739 = vmatprep.subr.bf16.mxu0 %v4169_v1  ;;  %v2577_v60 = vpop.permute.xlu1 %2576  ;;  %v2572_v58 = vpop.permute.xlu0 %2571 }
 0x146   :  { %3818 = vmatmul.mubr.bf16.gmra.mrb[4].mxu1 %v6348_v16  ;;  %v5711_v3 = vmul.f32 %v2577_v60, %v5370_v9  ;;  %v5714_v32 = vmul.f32 %v2572_v58, %v5376_v40  ;;  %v4174_v60 = vld [vmem:[%s6147_s4 + $0x168] sm:$0xff]   ;;  %v6354_v16 = vpack.c.bf16 %v5100_v24, %v5081_v52 }
 0x147   :  { %3834 = vmatpush3.bf16.msra.mxu1 %v4168_v44  ;;  %3821 = vmatprep.mubr.bf16.mxu1 %v6349_v29 }
 0x148   :  { %3740 = vmatpush3.bf16.msra.mxu0 %v4169_v1  ;;  %3835 = vmatprep.subr.bf16.mxu1 %v4170_v43  ;;  %v2665_v13 = vpack.c.bf16 %v5711_v3, %v5714_v32  ;;  %v6350_v1 = vpack.c.bf16 %v5478_v12, %v5481_v28 }
 0x149   :  { %3741 = vmatprep.subr.bf16.mxu0 %v4171_v17  ;;  %v906_v20 = vpop.permute.xlu1 %905  ;;  %v901_v44 = vpop.permute.xlu0 %900 }
 0x14a   :  { %v971_v33 = vmul.f32 %v906_v20, %v5370_v9  ;;  %v970_v61 = vmul.f32 %v901_v44, %v5376_v40  ;;  %v5743_v9 = vsel %vm854_vm1, %v838_v4, %v6352_v2  ;;  %v6356_v20 = vld [vmem:[#allocation42_spill] sm:$0xff] }
 0x14b   :  { %3836 = vmatpush3.bf16.msra.mxu1 %v4170_v43  ;;  %3726 = vmatmul.mubr.bf16.gmra.mrb[24].mxu0 %v6350_v1  ;;  %v6353_v43 = vrot.slane %v5182_v10, 1  ;;  %v969_v47 = vmul.f32 %v896_v23, %v5743_v9  ;;  %v6358_v23 = vld [vmem:[#allocation11_spill] sm:$0xff] }
 0x14c   :  { %3729 = vmatprep.mubr.bf16.mxu0 %v6351_v19  ;;  %3742 = vmatpush3.bf16.msra.mxu0 %v4171_v17  ;;  %v985_v28 = vpack.c.bf16 %v971_v33, %v970_v61  ;;  %v6359_v33 = vld [vmem:[#allocation10_spill] sm:$0xff] }
 0x14d   :  { %v5749_v12 = vsel %vm854_vm1, %v6353_v43, %v838_v4  ;;  %3837 = vmatprep.subr.bf16.mxu1 %v4172_v38  ;;  %3743 = vmatprep.subr.bf16.mxu0 %v4173_v31  ;;  %v2587_v17 = vpop.permute.xlu1 %2586  ;;  %v2582_v58 = vpop.permute.xlu0 %2581  ;;  %v6357_v4 = vpack.c.bf16 %v5207_v63, %v5171_v48  ;;  %v1753_v52 = vmul.f32 %v6359_v33, %v5376_v40  ;;  %v4177_v48 = vld [vmem:[%s6147_s4 + $0xb8] sm:$0xff]  }
 0x14e   :  { %v968_v53 = vmul.f32 %v891_v15, %v5749_v12  ;;  %3822 = vmatmul.mubr.bf16.gmra.mrb[8].mxu1 %v6354_v16  ;;  %v5760_v29 = vmul.f32 %v2587_v17, %v6355_v49  ;;  %v5763_v44 = vmul.f32 %v2582_v58, %v6356_v20  ;;  %v1752_v15 = vmul.f32 %v6358_v23, %v5743_v9  ;;  %v4178_v40 = vld [vmem:[%s6147_s4 + $0x178] sm:$0xff]   ;;  %v4180_v16 = vld [vmem:[%s6147_s4 + $0x188] sm:$0xff]   ;;  %v6361_v23 = vld [vmem:[#allocation5_spill] sm:$0xff] }
 0x14f   :  { %3838 = vmatpush3.bf16.msra.mxu1 %v4172_v38  ;;  %3825 = vmatprep.mubr.bf16.mxu1 %v6357_v4  ;;  %v4176_v38 = vld [vmem:[%s6147_s4 + $0x170] sm:$0xff]   ;;  %v6360_v17 = vpack.c.bf16 %v5182_v10, %v5165_v8 }
 0x150   :  { %3744 = vmatpush3.bf16.msra.mxu0 %v4173_v31  ;;  %3839 = vmatprep.subr.bf16.mxu1 %v4174_v60  ;;  %v2666_v24 = vpack.c.bf16 %v5760_v29, %v5763_v44  ;;  %v984_v63 = vpack.c.bf16 %v969_v47, %v968_v53  ;;  %v1768_v43 = vpack.c.bf16 %v1753_v52, %v1752_v15  ;;  %v6365_v52 = vld [vmem:[#allocation8_spill] sm:$0xff]  ;;  %v4204_v29 = vld [vmem:[%s6149_s6 + $0x8] sm:$0xff]   ;;  %v4205_v44 = vld [vmem:[%s6149_s6 + $0x10] sm:$0xff]  }
 0x151   :  { %3745 = vmatprep.subr.bf16.mxu0 %v4175_v25  ;;  %v916_v31 = vpop.permute.xlu1 %915  ;;  %v911_v61 = vpop.permute.xlu0 %910  ;;  %v6362_v15 = vpack.c.bf16 %v5443_v39, %v6361_v23 }
 0x152   :  { %v973_v1 = vmul.f32 %v916_v31, %v6355_v49  ;;  %v972_v19 = vmul.f32 %v911_v61, %v6356_v20 }
 0x153   :  { %3840 = vmatpush3.bf16.msra.mxu1 %v4174_v60  ;;  %3730 = vmatmul.mubr.bf16.gmra.mrb[28].mxu0 %v393_v37 }
 0x154   :  { %3746 = vmatpush3.bf16.msra.mxu0 %v4175_v25  ;;  %3749 = vmatprep.mubr.bf16.mxu0 %v984_v63  ;;  %v986_v2 = vpack.c.bf16 %v973_v1, %v972_v19  ;;  %v4182_v19 = vld [vmem:[%s6147_s4 + $0x198] sm:$0xff]  }
 0x155   :  { %3841 = vmatprep.subr.bf16.mxu1 %v4176_v38  ;;  %3747 = vmatprep.subr.bf16.mxu0 %v4177_v48  ;;  %v2597_v47 = vpop.permute.xlu1 %2596  ;;  %v2592_v53 = vpop.permute.xlu0 %2591 }
 0x156   :  { %3826 = vmatmul.mubr.bf16.gmra.mrb[12].mxu1 %v6360_v17  ;;  %v5792_v60 = vmul.f32 %v2597_v47, %v5449_v55  ;;  %v5795_v54 = vmul.f32 %v2592_v53, %v5462_v26  ;;  %v6367_v47 = vpack.c.bf16 %v5512_v14, %v5524_v36  ;;  %v6368_v17 = vpack.c.bf16 %v5532_v51, %v5488_v7  ;;  %v6369_v36 = vld [vmem:[#allocation20_spill] sm:$0xff]  ;;  %v6372_v51 = vld [vmem:[#allocation22_spill] sm:$0xff] }
 0x157   :  { %3842 = vmatpush3.bf16.msra.mxu1 %v4176_v38  ;;  %3845 = vmatprep.mubr.bf16.mxu1 %v1768_v43  ;;  %v1763_v14 = vmul.f32 %v6369_v36, %v5536_v27  ;;  %v4186_v36 = vld [vmem:[%s6147_s4 + $0x1b8] sm:$0xff]  }
 0x158   :  { %3748 = vmatpush3.bf16.msra.mxu0 %v4177_v48  ;;  %3843 = vmatprep.subr.bf16.mxu1 %v4178_v40  ;;  %v2667_v37 = vpack.c.bf16 %v5792_v60, %v5795_v54  ;;  %v4181_v48 = vld [vmem:[%s6147_s4 + $0x190] sm:$0xff]   ;;  %v4210_v54 = vld [vmem:[%s6149_s6 + $0x38] sm:$0xff]  }
 0x159   :  { %v926_v25 = vpop.permute.xlu1 %925  ;;  %v921_v8 = vpop.permute.xlu0 %920  ;;  %v4209_v60 = vld [vmem:[%s6149_s6 + $0x30] sm:$0xff]  }
 0x15a   :  { %v975_v10 = vmul.f32 %v926_v25, %v5449_v55  ;;  %v974_v58 = vmul.f32 %v921_v8, %v5462_v26  ;;  %v6363_v55 = vld [vmem:[#allocation13_spill] sm:$0xff] }
 0x15b   :  { %3844 = vmatpush3.bf16.msra.mxu1 %v4178_v40  ;;  %3750 = vmatmul.mubr.bf16.vlgmr.msra.gmra.mrb[16].mxu0 %v985_v28  ;;  %v6364_v28 = vld [vmem:[#allocation9_spill] sm:$0xff] }
 0x15c   :  { %3753 = vmatprep.mubr.bf16.mxu0 %v986_v2  ;;  %3861 = vmatprep.subr.bf16.mxu1 %v4179_v50  ;;  %v987_v49 = vpack.c.bf16 %v975_v10, %v974_v58  ;;  %v6366_v38 = vpack.c.bf16 %v6364_v28, %v6365_v52  ;;  %v6370_v8 = vld [vmem:[#allocation21_spill] sm:$0xff] }
 0x15d   :  { %v2607_v20 = vpop.permute.xlu1 %2606  ;;  %v2602_v4 = vpop.permute.xlu0 %2601  ;;  %v1762_v10 = vmul.f32 %v6370_v8, %v5528_v11 }
 0x15e   :  { %3846 = vmatmul.mubr.bf16.vlgmr.msra.gmra.mrb[0].mxu1 %v6362_v15  ;;  %v5811_v33 = vmul.f32 %v2607_v20, %v5475_v6  ;;  %v5814_v26 = vmul.f32 %v2602_v4, %v6363_v55  ;;  %v1765_v20 = vmul.f32 %v6372_v51, %v5566_v22 }
 0x15f   :  { %3862 = vmatpush3.bf16.msra.mxu1 %v4179_v50  ;;  %3849 = vmatprep.mubr.bf16.mxu1 %v6366_v38  ;;  %v4183_v50 = vld [vmem:[%s6147_s4 + $0x1a0] sm:$0xff]   ;;  %v1773_v15 = vpack.c.bf16 %v1763_v14, %v1762_v10 }
 0x160   :  { %3863 = vmatprep.subr.bf16.mxu1 %v4180_v16  ;;  %v2668_v39 = vpack.c.bf16 %v5811_v33, %v5814_v26 }
 0x161   :  { %v936_v63 = vpop.permute.xlu1 %935  ;;  %v931_v31 = vpop.permute.xlu0 %930 }
 0x162   :  { %v977_v61 = vmul.f32 %v936_v63, %v5475_v6  ;;  %v976_v1 = vmul.f32 %v931_v31, %v6363_v55  ;;  %v4184_v55 = vld [vmem:[%s6147_s4 + $0x1a8] sm:$0xff]  }
 0x163   :  { %3864 = vmatpush3.bf16.msra.mxu1 %v4180_v16  ;;  %3754 = vmatmul.mubr.bf16.gmra.mrb[20].mxu0 %v987_v49  ;;  %v6371_v49 = vld [vmem:[#allocation23_spill] sm:$0xff] }
 0x164   :  { %3865 = vmatprep.subr.bf16.mxu1 %v4181_v48  ;;  %v988_v40 = vpack.c.bf16 %v977_v61, %v976_v1  ;;  %v1764_v7 = vmul.f32 %v6371_v49, %v5554_v42  ;;  %v4185_v61 = vld [vmem:[%s6147_s4 + $0x1b0] sm:$0xff]   ;;  %v6374_v1 = vld [vmem:[#allocation25_spill] sm:$0xff] }
 0x165   :  { %v2617_v2 = vpop.permute.xlu1 %2616  ;;  %v2612_v43 = vpop.permute.xlu0 %2611 }
 0x166   :  { %3850 = vmatmul.mubr.bf16.gmra.mrb[4].mxu1 %v6367_v47  ;;  %v5833_v53 = vmul.f32 %v2617_v2, %v5528_v11  ;;  %v5836_v6 = vmul.f32 %v2612_v43, %v5516_v46  ;;  %3757 = vmatprep.mubr.bf16.mxu0 %v988_v40 }
 0x167   :  { %3866 = vmatpush3.bf16.msra.mxu1 %v4181_v48  ;;  %3853 = vmatprep.mubr.bf16.mxu1 %v6368_v17  ;;  %v1774_v48 = vpack.c.bf16 %v1765_v20, %v1764_v7 }
 0x168   :  { %3867 = vmatprep.subr.bf16.mxu1 %v4182_v19  ;;  %v2669_v25 = vpack.c.bf16 %v5833_v53, %v5836_v6 }
 0x169   :  { %v946_v58 = vpop.permute.xlu1 %945  ;;  %v941_v16 = vpop.permute.xlu0 %940 }
 0x16a   :  { %v979_v4 = vmul.f32 %v946_v58, %v5528_v11  ;;  %v978_v23 = vmul.f32 %v941_v16, %v5516_v46  ;;  %v6373_v46 = vld [vmem:[#allocation24_spill] sm:$0xff] }
 0x16b   :  { %3868 = vmatpush3.bf16.msra.mxu1 %v4182_v19  ;;  %v1767_v11 = vmul.f32 %v6373_v46, %v5749_v12  ;;  %v1766_v19 = vmul.f32 %v6374_v1, %v5572_v57  ;;  %v6383_v46 = vld [vmem:[#allocation50_spill] sm:$0xff]  ;;  %v4191_v1 = vld [vmem:[%s6147_s4 + $0x1e0] sm:$0xff]  }
 0x16c   :  { %3869 = vmatprep.subr.bf16.mxu1 %v4183_v50  ;;  %v989_v28 = vpack.c.bf16 %v979_v4, %v978_v23  ;;  %v6376_v23 = vld [vmem:[#allocation45_spill] sm:$0xff] }
 0x16d   :  { %v2627_v52 = vpop.permute.xlu1 %2626  ;;  %v2622_v38 = vpop.permute.xlu0 %2621 }
 0x16e   :  { %3854 = vmatmul.mubr.bf16.gmra.mrb[8].mxu1 %v1773_v15  ;;  %v5860_v63 = vmul.f32 %v2627_v52, %v5554_v42  ;;  %v5863_v31 = vmul.f32 %v2622_v38, %v5536_v27  ;;  %3758 = vmatmul.mubr.bf16.gmra.mrb[24].mxu0 %v989_v28  ;;  %v6377_v15 = vld [vmem:[#allocation36_spill] sm:$0xff]  ;;  %v6380_v52 = vld [vmem:[#allocation49_spill] sm:$0xff] }
 0x16f   :  { %3870 = vmatpush3.bf16.msra.mxu1 %v4183_v50  ;;  %3857 = vmatprep.mubr.bf16.mxu1 %v1774_v48  ;;  %v1775_v50 = vpack.c.bf16 %v1767_v11, %v1766_v19  ;;  %v6379_v28 = vld [vmem:[#allocation48_spill] sm:$0xff]  ;;  %v6382_v48 = vld [vmem:[#allocation53_spill] sm:$0xff]  ;;  %v4192_v19 = vld [vmem:[%s6147_s4 + $0x1e8] sm:$0xff]  }
 0x170   :  { %3871 = vmatprep.subr.bf16.mxu1 %v4184_v55  ;;  %v2670_v40 = vpack.c.bf16 %v5860_v63, %v5863_v31  ;;  %v6381_v38 = vpack.c.bf16 %v6379_v28, %v6380_v52  ;;  %v6384_v11 = vpack.c.bf16 %v6382_v48, %v6383_v46  ;;  %v6405_v28 = vld [vmem:[#allocation15_spill] sm:$0xff]  ;;  %v6406_v52 = vld [vmem:[#allocation12_spill] sm:$0xff] }
 0x171   :  { %v956_v2 = vpop.permute.xlu1 %955  ;;  %v951_v43 = vpop.permute.xlu0 %950  ;;  %v4201_v46 = vld [vmem:[%s6147_s4 + $0x230] sm:$0xff]  }
 0x172   :  { %v981_v47 = vmul.f32 %v956_v2, %v5554_v42  ;;  %v980_v17 = vmul.f32 %v951_v43, %v5536_v27  ;;  %v6375_v27 = vpack.c.bf16 %v6315_v18, %v6314_v35  ;;  %v4187_v42 = vld [vmem:[%s6147_s4 + $0x1c0] sm:$0xff]   ;;  %v4188_v18 = vld [vmem:[%s6147_s4 + $0x1c8] sm:$0xff]   ;;  %v6386_v2 = vpack.c.bf16 %v5615_v62, %v5611_v59  ;;  %v6387_v43 = vld [vmem:[#allocation19_spill] sm:$0xff] }
 0x173   :  { %3872 = vmatpush3.bf16.msra.mxu1 %v4184_v55  ;;  %v6378_v55 = vpack.c.bf16 %v6376_v23, %v6377_v15  ;;  %v6390_v59 = vld [vmem:[#allocation43_spill] sm:$0xff]  ;;  %v6391_v62 = vld [vmem:[#allocation44_spill] sm:$0xff]  ;;  %v4199_v15 = vld [vmem:[%s6147_s4 + $0x220] sm:$0xff]  }
 0x174   :  { %3873 = vmatprep.subr.bf16.mxu1 %v4185_v61  ;;  %v990_v14 = vpack.c.bf16 %v981_v47, %v980_v17  ;;  %v6388_v47 = vld [vmem:[#allocation14_spill] sm:$0xff]  ;;  %v4194_v17 = vld [vmem:[%s6147_s4 + $0x1f8] sm:$0xff]  }
 0x175   :  { %v2637_v8 = vpop.permute.xlu1 %2636  ;;  %v2632_v10 = vpop.permute.xlu0 %2631 }
 0x176   :  { %3858 = vmatmul.mubr.bf16.gmra.mrb[12].mxu1 %v1775_v50  ;;  %v5880_v58 = vmul.f32 %v2637_v8, %v5572_v57  ;;  %v5883_v16 = vmul.f32 %v2632_v10, %v5566_v22  ;;  %3761 = vmatprep.mubr.bf16.mxu0 %v990_v14  ;;  %v6392_v50 = vpack.c.bf16 %v6390_v59, %v6391_v62  ;;  %v4196_v14 = vld [vmem:[%s6147_s4 + $0x208] sm:$0xff]   ;;  %v6393_v8 = vld [vmem:[#allocation51_spill] sm:$0xff]  ;;  %v6394_v10 = vld [vmem:[#allocation52_spill] sm:$0xff] }
 0x177   :  { %3874 = vmatpush3.bf16.msra.mxu1 %v4185_v61  ;;  %3877 = vmatprep.mubr.bf16.mxu1 %v6375_v27  ;;  %v6385_v61 = vpack.c.bf16 %v6330_v41, %v5604_v0  ;;  %v6389_v0 = vpack.c.bf16 %v6387_v43, %v6388_v47  ;;  %v4193_v41 = vld [vmem:[%s6147_s4 + $0x1f0] sm:$0xff]   ;;  %v6395_v21 = vpack.c.bf16 %v6393_v8, %v6394_v10  ;;  %v6041_v43 = vld [vmem:[%s6148_s5] ss:$0 sm:$0xff] }
 0x178   :  { %3875 = vmatprep.subr.bf16.mxu1 %v4186_v36  ;;  %v2671_v49 = vpack.c.bf16 %v5880_v58, %v5883_v16 }
 0x179   :  { %v966_v7 = vpop.permute.xlu1 %965  ;;  %v961_v51 = vpop.permute.xlu0 %960 }
 0x17a   :  { %v983_v20 = vmul.f32 %v966_v7, %v5572_v57  ;;  %v982_v4 = vmul.f32 %v961_v51, %v5566_v22  ;;  %v4189_v22 = vld [vmem:[%s6147_s4 + $0x1d0] sm:$0xff]   ;;  %v4190_v57 = vld [vmem:[%s6147_s4 + $0x1d8] sm:$0xff]  }
 0x17b   :  { %3876 = vmatpush3.bf16.msra.mxu1 %v4186_v36  ;;  %v4195_v36 = vld [vmem:[%s6147_s4 + $0x200] sm:$0xff]   ;;  %v4198_v7 = vld [vmem:[%s6147_s4 + $0x218] sm:$0xff]  }
 0x17c   :  { %3893 = vmatprep.subr.bf16.mxu1 %v4187_v42  ;;  %v991_v35 = vpack.c.bf16 %v983_v20, %v982_v4  ;;  %v6399_v51 = vld [vmem:[#allocation32_spill] sm:$0xff]  ;;  %v6400_v20 = vld [vmem:[#allocation35_spill] sm:$0xff] }
 0x17d   :  { %v6401_v4 = vpack.c.bf16 %v6399_v51, %v6400_v20  ;;  %v2647_v56 = vpop.permute.xlu1 %2646  ;;  %v2642_v5 = vpop.permute.xlu0 %2641 }
 0x17e   :  { %3878 = vmatmul.mubr.bf16.vlgmr.msra.gmra.mrb[0].mxu1 %v6378_v55  ;;  %3762 = vmatmul.mubr.bf16.gmra.mrb[28].mxu0 %v991_v35  ;;  %v6403_v35 = vld [vmem:[#allocation38_spill] sm:$0xff]  ;;  %v2663_v3 = vmul.f32 %v2642_v5, %v5749_v12  ;;  %v4207_v12 = vld [vmem:[%s6149_s6 + $0x20] sm:$0xff]  }
 0x17f   :  { %3894 = vmatpush3.bf16.msra.mxu1 %v4187_v42  ;;  %3881 = vmatprep.mubr.bf16.mxu1 %v6381_v38  ;;  %v4197_v42 = vld [vmem:[%s6147_s4 + $0x210] sm:$0xff]   ;;  %v4200_v55 = vld [vmem:[%s6147_s4 + $0x228] sm:$0xff]   ;;  %v6407_v38 = vpack.c.bf16 %v6405_v28, %v6406_v52 }
 0x180   :  { %3895 = vmatprep.subr.bf16.mxu1 %v4188_v18 }
 0x183   :  { %3896 = vmatpush3.bf16.msra.mxu1 %v4188_v18  ;;  %v6402_v18 = vld [vmem:[#allocation7_spill] sm:$0xff] }
 0x184   :  { %3897 = vmatprep.subr.bf16.mxu1 %v4189_v22  ;;  %v6404_v23 = vpack.c.bf16 %v6402_v18, %v6403_v35 }
 0x186   :  { %3882 = vmatmul.mubr.bf16.gmra.mrb[4].mxu1 %v6384_v11  ;;  %v4202_v11 = vld [vmem:[%s6147_s4 + $0x238] sm:$0xff]  }
 0x187   :  { %3898 = vmatpush3.bf16.msra.mxu1 %v4189_v22  ;;  %3885 = vmatprep.mubr.bf16.mxu1 %v6385_v61  ;;  %v6408_v22 = vld [vmem:[#allocation16_spill] sm:$0xff] }
 0x188   :  { %3899 = vmatprep.subr.bf16.mxu1 %v4190_v57 }
 0x18b   :  { %3900 = vmatpush3.bf16.msra.mxu1 %v4190_v57  ;;  %v6409_v57 = vld [vmem:[#allocation17_spill] sm:$0xff] }
 0x18c   :  { %3901 = vmatprep.subr.bf16.mxu1 %v4191_v1  ;;  %v6410_v48 = vpack.c.bf16 %v6408_v22, %v6409_v57 }
 0x18e   :  { %3886 = vmatmul.mubr.bf16.gmra.mrb[8].mxu1 %v6386_v2 }
 0x18f   :  { %3902 = vmatpush3.bf16.msra.mxu1 %v4191_v1  ;;  %3889 = vmatprep.mubr.bf16.mxu1 %v6389_v0 }
 0x190   :  { %3903 = vmatprep.subr.bf16.mxu1 %v4192_v19 }
 0x193   :  { %3904 = vmatpush3.bf16.msra.mxu1 %v4192_v19 }
 0x194   :  { %3905 = vmatprep.subr.bf16.mxu1 %v4193_v41 }
 0x196   :  { %3890 = vmatmul.mubr.bf16.gmra.mrb[12].mxu1 %v2074_v45  ;;  %v6396_v45 = vld [vmem:[#allocation57_spill] sm:$0xff] }
 0x197   :  { %3906 = vmatpush3.bf16.msra.mxu1 %v4193_v41  ;;  %3909 = vmatprep.mubr.bf16.mxu1 %v6392_v50  ;;  %v6398_v27 = vpack.c.bf16 %v6396_v45, %v6397_v34 }
 0x198   :  { %3907 = vmatprep.subr.bf16.mxu1 %v4194_v17 }
 0x19b   :  { %3908 = vmatpush3.bf16.msra.mxu1 %v4194_v17 }
 0x19c   :  { %3925 = vmatprep.subr.bf16.mxu1 %v4195_v36 }
 0x19e   :  { %3910 = vmatmul.mubr.bf16.vlgmr.msra.gmra.mrb[0].mxu1 %v6395_v21 }
 0x19f   :  { %3926 = vmatpush3.bf16.msra.mxu1 %v4195_v36  ;;  %3913 = vmatprep.mubr.bf16.mxu1 %v6398_v27 }
 0x1a0   :  { %3927 = vmatprep.subr.bf16.mxu1 %v4196_v14 }
 0x1a3   :  { %3928 = vmatpush3.bf16.msra.mxu1 %v4196_v14 }
 0x1a4   :  { %3929 = vmatprep.subr.bf16.mxu1 %v4197_v42 }
 0x1a6   :  { %3914 = vmatmul.mubr.bf16.gmra.mrb[4].mxu1 %v6401_v4 }
 0x1a7   :  { %3930 = vmatpush3.bf16.msra.mxu1 %v4197_v42  ;;  %3917 = vmatprep.mubr.bf16.mxu1 %v6404_v23 }
 0x1a8   :  { %3931 = vmatprep.subr.bf16.mxu1 %v4198_v7 }
 0x1ab   :  { %3932 = vmatpush3.bf16.msra.mxu1 %v4198_v7 }
 0x1ac   :  { %3933 = vmatprep.subr.bf16.mxu1 %v4199_v15 }
 0x1ae   :  { %3918 = vmatmul.mubr.bf16.gmra.mrb[8].mxu1 %v6407_v38 }
 0x1af   :  { %3934 = vmatpush3.bf16.msra.mxu1 %v4199_v15  ;;  %3921 = vmatprep.mubr.bf16.mxu1 %v6410_v48 }
 0x1b0   :  { %3935 = vmatprep.subr.bf16.mxu1 %v4200_v55 }
 0x1b3   :  { %3936 = vmatpush3.bf16.msra.mxu1 %v4200_v55 }
 0x1b4   :  { %3937 = vmatprep.subr.bf16.mxu1 %v4201_v46 }
 0x1b6   :  { %3922 = vmatmul.mubr.bf16.gmra.mrb[12].mxu1 %v2373_v30  ;;  %v2664_v30 = vmul.f32 %v2647_v56, %v5743_v9  ;;  %v4206_v9 = vld [vmem:[%s6149_s6 + $0x18] sm:$0xff]  }
 0x1b7   :  { %3938 = vmatpush3.bf16.msra.mxu1 %v4201_v46  ;;  %3941 = vmatprep.mubr.bf16.mxu1 %v2665_v13  ;;  %v4203_v13 = vld [vmem:[%s6149_s6] sm:$0xff]  }
 0x1b8   :  { %3939 = vmatprep.subr.bf16.mxu1 %v4202_v11  ;;  %v2672_v32 = vpack.c.bf16 %v2664_v30, %v2663_v3  ;;  %3957 = vmatprep.subr.bf16.mxu0 %v4203_v13 }
 0x1b9   :  { %3958 = vmatpush3.bf16.msra.mxu0 %v4203_v13 }
 0x1ba   :  { %3959 = vmatprep.subr.bf16.mxu0 %v4204_v29 }
 0x1bb   :  { %3940 = vmatpush3.bf16.msra.mxu1 %v4202_v11 }
 0x1bd   :  { %3960 = vmatpush3.bf16.msra.mxu0 %v4204_v29 }
 0x1be   :  { %3942 = vmatmul.mubr.bf16.vlgmr.msra.gmra.mrb[0].mxu1 %v2666_v24  ;;  %3961 = vmatprep.subr.bf16.mxu0 %v4205_v44  ;;  %v4208_v24 = vld [vmem:[%s6149_s6 + $0x28] sm:$0xff]  }
 0x1bf   :  { %3945 = vmatprep.mubr.bf16.mxu1 %v2667_v37 }
 0x1c1   :  { %3962 = vmatpush3.bf16.msra.mxu0 %v4205_v44 }
 0x1c2   :  { %3963 = vmatprep.subr.bf16.mxu0 %v4206_v9 }
 0x1c5   :  { %3964 = vmatpush3.bf16.msra.mxu0 %v4206_v9 }
 0x1c6   :  { %3946 = vmatmul.mubr.bf16.gmra.mrb[4].mxu1 %v2668_v39  ;;  %3965 = vmatprep.subr.bf16.mxu0 %v4207_v12 }
 0x1c7   :  { %3949 = vmatprep.mubr.bf16.mxu1 %v2669_v25 }
 0x1c9   :  { %3966 = vmatpush3.bf16.msra.mxu0 %v4207_v12 }
 0x1ca   :  { %3967 = vmatprep.subr.bf16.mxu0 %v4208_v24 }
 0x1cd   :  { %3968 = vmatpush3.bf16.msra.mxu0 %v4208_v24 }
 0x1ce   :  { %3950 = vmatmul.mubr.bf16.gmra.mrb[8].mxu1 %v2670_v40  ;;  %3969 = vmatprep.subr.bf16.mxu0 %v4209_v60 }
 0x1cf   :  { %3953 = vmatprep.mubr.bf16.mxu1 %v2671_v49 }
 0x1d1   :  { %3970 = vmatpush3.bf16.msra.mxu0 %v4209_v60 }
 0x1d2   :  { %3971 = vmatprep.subr.bf16.mxu0 %v4210_v54 }
 0x1d5   :  { %3972 = vmatpush3.bf16.msra.mxu0 %v4210_v54 }
 0x1d6   :  { %3954 = vmatmul.mubr.bf16.gmra.mrb[12].mxu1 %v2672_v32 }
 0x22e   :  { %v3751_v37 = vpop.f32.mrb[16].mxu0 }
 0x22f   :  { %v1091_v33 = vpop.f32.mrb[17].mxu0 }
 0x230   :  { %v3752_v26 = vpop.f32.mrb[18].mxu0 }
 0x231   :  { %v1094_v39 = vpop.f32.mrb[19].mxu0 }
 0x236   :  { %v3755_v53 = vpop.f32.mrb[20].mxu0 }
 0x237   :  { %v1107_v6 = vpop.f32.mrb[21].mxu0 }
 0x238   :  { %v3756_v25 = vpop.f32.mrb[22].mxu0 }
 0x239   :  { %v1110_v63 = vpop.f32.mrb[23].mxu0 }
 0x241   :  { %v3759_v31 = vpop.f32.mrb[24].mxu0 }
 0x242   :  { %v1123_v40 = vpop.f32.mrb[25].mxu0 }
 0x243   :  { %v3760_v58 = vpop.f32.mrb[26].mxu0 }
 0x244   :  { %v1126_v16 = vpop.f32.mrb[27].mxu0 }
 0x251   :  { %v3763_v49 = vpop.f32.mrb[28].mxu0 }
 0x252   :  { %v6032_v61 = vpop.f32.mrb[29].mxu0 }
 0x253   :  { %v6034_v1 = vpop.f32.mrb[30].mxu0 }
 0x254   :  { %v6036_v19 = vpop.f32.mrb[31].mxu0 }
 0x291   :  { %v3943_v2 = vpop.f32.mrb[0].mxu1 }
 0x292   :  { %v3989_v47 = vadd.f32 %v3943_v2, %v3751_v37  ;;  %v2772_v0 = vpop.f32.mrb[1].mxu1 }
 0x293   :  { %v3990_v41 = vadd.f32 %v2772_v0, %v1091_v33  ;;  %v3944_v17 = vpop.f32.mrb[2].mxu1 }
 0x294   :  { %v2860_v59 = vadd.f32 %v3989_v47, %v6041_v43  ;;  %v3991_v62 = vadd.f32 %v3944_v17, %v3752_v26  ;;  %v2775_v50 = vpop.f32.mrb[3].mxu1 }
 0x295   :  { %v2858_v36 = vadd.f32 %v3990_v41, %v6041_v43  ;;  %v3992_v14 = vadd.f32 %v2775_v50, %v1094_v39 }
 0x296   :  { %v2861_v8 = vadd.f32 %v3991_v62, %v6041_v43  ;;  %v2876_v21 = vmax.f32 %v2860_v59, 0.0 }
 0x297   :  { %v2859_v10 = vadd.f32 %v3992_v14, %v6041_v43  ;;  %v2874_v34 = vmax.f32 %v2858_v36, 0.0 }
 0x298   :  { %v2877_v45 = vmax.f32 %v2861_v8, 0.0 }
 0x299   :  { %v2875_v27 = vmax.f32 %v2859_v10, 0.0  ;;  %v3947_v42 = vpop.f32.mrb[4].mxu1 }
 0x29a   :  { %v2891_v7 = vpack.c.bf16 %v2877_v45, %v2876_v21  ;;  %v3993_v51 = vadd.f32 %v3947_v42, %v3755_v53  ;;  %v2788_v20 = vpop.f32.mrb[5].mxu1 }
 0x29b   :  { %v3994_v4 = vadd.f32 %v2788_v20, %v1107_v6  ;;  %v3948_v18 = vpop.f32.mrb[6].mxu1  ;;  %v2890_v35 = vpack.c.bf16 %v2875_v27, %v2874_v34  ;;  %v4211_v34 = vld [vmem:[%s6143_s0 + $0x10] sm:$0xff] }
 0x29c   :  { %v2864_v23 = vadd.f32 %v3993_v51, %v6041_v43  ;;  %v3995_v15 = vadd.f32 %v3948_v18, %v3756_v25  ;;  %v2791_v55 = vpop.f32.mrb[7].mxu1  ;;  %v4212_v51 = vld [vmem:[%s6143_s0] sm:$0xff] }
 0x29d   :  { %v2862_v28 = vadd.f32 %v3994_v4, %v6041_v43  ;;  %v3996_v52 = vadd.f32 %v2791_v55, %v1110_v63  ;;  %3973 = vmatprep.mubr.bf16.mxu0 %v2890_v35  ;;  %v4213_v35 = vld [vmem:[%s6143_s0 + $0x18] sm:$0xff]  ;;  %v4214_v55 = vld [vmem:[%s6143_s0 + $0x8] sm:$0xff] }
 0x29e   :  { %v2865_v38 = vadd.f32 %v3995_v15, %v6041_v43  ;;  %3974 = vmatmul.mubr.bf16.vlgmr.msra.gmra.mrb[32].mxu0 %v2891_v7  ;;  %v2880_v57 = vmax.f32 %v2864_v23, 0.0 }
 0x29f   :  { %v2863_v22 = vadd.f32 %v3996_v52, %v6041_v43  ;;  %v2878_v46 = vmax.f32 %v2862_v28, 0.0 }
 0x2a0   :  { %v2881_v48 = vmax.f32 %v2865_v38, 0.0 }
 0x2a1   :  { %v2879_v11 = vmax.f32 %v2863_v22, 0.0  ;;  %v3951_v56 = vpop.f32.mrb[8].mxu1 }
 0x2a2   :  { %v3997_v5 = vadd.f32 %v3951_v56, %v3759_v31  ;;  %v2804_v30 = vpop.f32.mrb[9].mxu1  ;;  %v2893_v3 = vpack.c.bf16 %v2881_v48, %v2880_v57  ;;  %v4215_v56 = vld [vmem:[%s6143_s0 + $0x30] sm:$0xff] }
 0x2a3   :  { %v3998_v32 = vadd.f32 %v2804_v30, %v1123_v40  ;;  %v3952_v13 = vpop.f32.mrb[10].mxu1  ;;  %v2892_v29 = vpack.c.bf16 %v2879_v11, %v2878_v46 }
 0x2a4   :  { %v2868_v44 = vadd.f32 %v3997_v5, %v6041_v43  ;;  %v3999_v9 = vadd.f32 %v3952_v13, %v3760_v58  ;;  %v2807_v12 = vpop.f32.mrb[11].mxu1 }
 0x2a5   :  { %v2866_v24 = vadd.f32 %v3998_v32, %v6041_v43  ;;  %v4000_v60 = vadd.f32 %v2807_v12, %v1126_v16  ;;  %3977 = vmatprep.mubr.bf16.mxu0 %v2892_v29  ;;  %v4216_v32 = vld [vmem:[%s6143_s0 + $0x20] sm:$0xff] }
 0x2a6   :  { %v2869_v54 = vadd.f32 %v3999_v9, %v6041_v43  ;;  %3978 = vmatmul.mubr.bf16.gmra.mrb[36].mxu0 %v2893_v3  ;;  %v2884_v33 = vmax.f32 %v2868_v44, 0.0  ;;  %v4217_v9 = vld [vmem:[%s6143_s0 + $0x38] sm:$0xff] }
 0x2a7   :  { %v2867_v37 = vadd.f32 %v4000_v60, %v6041_v43  ;;  %v2882_v39 = vmax.f32 %v2866_v24, 0.0  ;;  %v4218_v60 = vld [vmem:[%s6143_s0 + $0x28] sm:$0xff] }
 0x2a8   :  { %v2885_v26 = vmax.f32 %v2869_v54, 0.0 }
 0x2a9   :  { %v2883_v53 = vmax.f32 %v2867_v37, 0.0  ;;  %v3955_v6 = vpop.f32.mrb[12].mxu1 }
 0x2aa   :  { %v4001_v25 = vadd.f32 %v3955_v6, %v3763_v49  ;;  %v2820_v63 = vpop.f32.mrb[13].mxu1  ;;  %v2895_v31 = vpack.c.bf16 %v2885_v26, %v2884_v33 }
 0x2ab   :  { %v4002_v40 = vadd.f32 %v2820_v63, %v6032_v61  ;;  %v3956_v58 = vpop.f32.mrb[14].mxu1  ;;  %v2894_v2 = vpack.c.bf16 %v2883_v53, %v2882_v39  ;;  %v4219_v63 = vld [vmem:[%s6143_s0 + $0x50] sm:$0xff] }
 0x2ac   :  { %v2872_v16 = vadd.f32 %v4001_v25, %v6041_v43  ;;  %v4003_v47 = vadd.f32 %v3956_v58, %v6034_v1  ;;  %v2823_v0 = vpop.f32.mrb[15].mxu1  ;;  %v6065_v1 = vld [vmem:[%s6150_s7] ss:$0 sm:$0xff] }
 0x2ad   :  { %v2870_v41 = vadd.f32 %v4002_v40, %v6041_v43  ;;  %v4004_v17 = vadd.f32 %v2823_v0, %v6036_v19  ;;  %3981 = vmatprep.mubr.bf16.mxu0 %v2894_v2  ;;  %v4220_v2 = vld [vmem:[%s6143_s0 + $0x40] sm:$0xff] }
 0x2ae   :  { %v2873_v59 = vadd.f32 %v4003_v47, %v6041_v43  ;;  %3982 = vmatmul.mubr.bf16.gmra.mrb[40].mxu0 %v2895_v31  ;;  %v2888_v62 = vmax.f32 %v2872_v16, 0.0 }
 0x2af   :  { %v2871_v49 = vadd.f32 %v4004_v17, %v6041_v43  ;;  %v2886_v61 = vmax.f32 %v2870_v41, 0.0  ;;  %v4221_v41 = vld [vmem:[%s6143_s0 + $0x58] sm:$0xff] }
 0x2b0   :  { %v2889_v50 = vmax.f32 %v2873_v59, 0.0 }
 0x2b1   :  { %v2887_v36 = vmax.f32 %v2871_v49, 0.0  ;;  %v4222_v49 = vld [vmem:[%s6143_s0 + $0x48] sm:$0xff] }
 0x2b2   :  { %v2897_v14 = vpack.c.bf16 %v2889_v50, %v2888_v62 }
 0x2b3   :  { %v2896_v8 = vpack.c.bf16 %v2887_v36, %v2886_v61 }
 0x2b5   :  { %3985 = vmatprep.mubr.bf16.mxu0 %v2896_v8 }
 0x2b6   :  { %3986 = vmatmul.mubr.bf16.gmra.mrb[44].mxu0 %v2897_v14 }
 0x371   :  { %v3975_v19 = vpop.f32.mrb[32].mxu0 }
 0x372   :  { %v3012_v10 = vadd.f32 %v3975_v19, %v6065_v1  ;;  %v3003_v21 = vpop.f32.mrb[33].mxu0 }
 0x373   :  { %v3004_v45 = vadd.f32 %v6065_v1, %v3003_v21  ;;  %v3976_v43 = vpop.f32.mrb[34].mxu0  ;;  %v4223_v21 = vld [vmem:[%s6143_s0 + $0x70] sm:$0xff] }
 0x374   :  { %v3068_v27 = vadd.f32 %v4211_v34, %v3012_v10  ;;  %v3015_v42 = vadd.f32 %v3976_v43, %v6065_v1  ;;  %v3006_v7 = vpop.f32.mrb[35].mxu0 }
 0x375   :  { %v3066_v20 = vadd.f32 %v4212_v51, %v3004_v45  ;;  %v3007_v4 = vadd.f32 %v6065_v1, %v3006_v7 }
 0x376   :  { %v3084_v18 = vmax.f32 %v3068_v27, 0.0  ;;  %v3069_v23 = vadd.f32 %v4213_v35, %v3015_v42  ;;  %v4224_v27 = vld [vmem:[%s6143_s0 + $0x60] sm:$0xff]  ;;  %v4226_v35 = vld [vmem:[%s6143_s0 + $0x68] sm:$0xff] }
 0x377   :  { %v3082_v15 = vmax.f32 %v3066_v20, 0.0  ;;  %v3067_v28 = vadd.f32 %v4214_v55, %v3007_v4  ;;  %v4225_v20 = vld [vmem:[%s6143_s0 + $0x78] sm:$0xff] }
 0x378   :  { %3100 = vst [vmem:[#allocation2 + $0x10] sm:$0xff] %v3084_v18  ;;  %v3085_v52 = vmax.f32 %v3069_v23, 0.0 }
 0x379   :  { %3098 = vst [vmem:[#allocation2] sm:$0xff] %v3082_v15  ;;  %v3083_v38 = vmax.f32 %v3067_v28, 0.0  ;;  %v3979_v22 = vpop.f32.mrb[36].mxu0 }
 0x37a   :  { %3101 = vst [vmem:[#allocation2 + $0x18] sm:$0xff] %v3085_v52  ;;  %v3028_v57 = vadd.f32 %v3979_v22, %v6065_v1  ;;  %v3019_v48 = vpop.f32.mrb[37].mxu0 }
 0x37b   :  { %3099 = vst [vmem:[#allocation2 + $0x8] sm:$0xff] %v3083_v38  ;;  %v3020_v46 = vadd.f32 %v6065_v1, %v3019_v48  ;;  %v3980_v11 = vpop.f32.mrb[38].mxu0 }
 0x37c   :  { %v3072_v5 = vadd.f32 %v4215_v56, %v3028_v57  ;;  %v3031_v30 = vadd.f32 %v3980_v11, %v6065_v1  ;;  %v3022_v3 = vpop.f32.mrb[39].mxu0 }
 0x37d   :  { %v3070_v13 = vadd.f32 %v4216_v32, %v3020_v46  ;;  %v3023_v29 = vadd.f32 %v6065_v1, %v3022_v3 }
 0x37e   :  { %v3088_v44 = vmax.f32 %v3072_v5, 0.0  ;;  %v3073_v12 = vadd.f32 %v4217_v9, %v3031_v30 }
 0x37f   :  { %v3086_v24 = vmax.f32 %v3070_v13, 0.0  ;;  %v3071_v54 = vadd.f32 %v4218_v60, %v3023_v29 }
 0x380   :  { %3104 = vst [vmem:[#allocation2 + $0x30] sm:$0xff] %v3088_v44  ;;  %v3089_v37 = vmax.f32 %v3073_v12, 0.0 }
 0x381   :  { %3102 = vst [vmem:[#allocation2 + $0x20] sm:$0xff] %v3086_v24  ;;  %v3087_v33 = vmax.f32 %v3071_v54, 0.0  ;;  %v3983_v26 = vpop.f32.mrb[40].mxu0 }
 0x382   :  { %3105 = vst [vmem:[#allocation2 + $0x38] sm:$0xff] %v3089_v37  ;;  %v3044_v39 = vadd.f32 %v3983_v26, %v6065_v1  ;;  %v3035_v53 = vpop.f32.mrb[41].mxu0 }
 0x383   :  { %3103 = vst [vmem:[#allocation2 + $0x28] sm:$0xff] %v3087_v33  ;;  %v3036_v6 = vadd.f32 %v6065_v1, %v3035_v53  ;;  %v3984_v25 = vpop.f32.mrb[42].mxu0 }
 0x384   :  { %v3076_v31 = vadd.f32 %v4219_v63, %v3044_v39  ;;  %v3047_v40 = vadd.f32 %v3984_v25, %v6065_v1  ;;  %v3038_v58 = vpop.f32.mrb[43].mxu0 }
 0x385   :  { %v3074_v16 = vadd.f32 %v4220_v2, %v3036_v6  ;;  %v3039_v47 = vadd.f32 %v6065_v1, %v3038_v58 }
 0x386   :  { %v3092_v0 = vmax.f32 %v3076_v31, 0.0  ;;  %v3077_v17 = vadd.f32 %v4221_v41, %v3047_v40 }
 0x387   :  { %v3090_v59 = vmax.f32 %v3074_v16, 0.0  ;;  %v3075_v62 = vadd.f32 %v4222_v49, %v3039_v47 }
 0x388   :  { %3108 = vst [vmem:[#allocation2 + $0x50] sm:$0xff] %v3092_v0  ;;  %v3093_v50 = vmax.f32 %v3077_v17, 0.0 }
 0x389   :  { %3106 = vst [vmem:[#allocation2 + $0x40] sm:$0xff] %v3090_v59  ;;  %v3091_v61 = vmax.f32 %v3075_v62, 0.0  ;;  %v3987_v36 = vpop.f32.mrb[44].mxu0 }
 0x38a   :  { %3109 = vst [vmem:[#allocation2 + $0x58] sm:$0xff] %v3093_v50  ;;  %v3060_v14 = vadd.f32 %v3987_v36, %v6065_v1  ;;  %v3051_v8 = vpop.f32.mrb[45].mxu0 }
 0x38b   :  { %3107 = vst [vmem:[#allocation2 + $0x48] sm:$0xff] %v3091_v61  ;;  %v3052_v19 = vadd.f32 %v6065_v1, %v3051_v8  ;;  %v3988_v10 = vpop.f32.mrb[46].mxu0 }
 0x38c   :  { %v3080_v45 = vadd.f32 %v4223_v21, %v3060_v14  ;;  %v3063_v43 = vadd.f32 %v3988_v10, %v6065_v1  ;;  %v3054_v34 = vpop.f32.mrb[47].mxu0 }
 0x38d   :  { %v3078_v42 = vadd.f32 %v4224_v27, %v3052_v19  ;;  %v3055_v7 = vadd.f32 %v6065_v1, %v3054_v34 }
 0x38e   :  { %v3096_v51 = vmax.f32 %v3080_v45, 0.0  ;;  %v3081_v4 = vadd.f32 %v4225_v20, %v3063_v43 }
 0x38f   :  { %v3094_v18 = vmax.f32 %v3078_v42, 0.0  ;;  %v3079_v23 = vadd.f32 %v4226_v35, %v3055_v7 }
 0x390   :  { %3112 = vst [vmem:[#allocation2 + $0x70] sm:$0xff] %v3096_v51  ;;  %v3097_v15 = vmax.f32 %v3081_v4, 0.0 }
 0x391   :  { %3110 = vst [vmem:[#allocation2 + $0x60] sm:$0xff] %v3094_v18  ;;  %v3095_v55 = vmax.f32 %v3079_v23, 0.0 }
 0x392   :  { %3113 = vst [vmem:[#allocation2 + $0x78] sm:$0xff] %v3097_v15 }
 0x393   :  { %3111 = vst [vmem:[#allocation2 + $0x68] sm:$0xff] %v3095_v55 }
 0x394   :  { %4238 = shalt.err (!%p4235_p4)
}
 0x395   :  { %s4239_s9 = scalar_lea.hbm %s6151_s8, 2048 }
 0x396   :  { %p4240_p5 = scmp.ne.s32.totalorder %s6151_s8, %s4239_s9  ;;  %p4243_p6 = scmp.lt.u32.totalorder %s4239_s9, %s6151_s8 }
 0x398   :  { %p4245_p7 = pnand %p4243_p6, %p4240_p5 }
 0x39a   :  { %4248 = shalt.err (!%p4245_p7)
}
 0x39b   :  { %s4253_s12 = smov 128   ;;  %s4254_s13 = smov 8  }
 0x39c   :  { %3125 = dma.vmem_to_hbm [thread:$0]  %s3120_s26, 2048, %s6151_s8, [#allocation3], %s4253_s12, %s4253_s12, %s4254_s13  }
 0x39d   :  { %4249 = dma.done.wait [#allocation3], 2048  }
 0x39e   :  { %4250 = vsyncadd [#allocation3], 4294965248 }
 0x39f   :  { %3129 = vsyncpa [#allocation3], 1 }

</bundles_post_ra>
